<compile_context>
chip_gen: v7x
topology: tpu7x:2x2x1
jax: 0.10.0
libtpu: 0.0.40
codegen_flags: <defaults>
</compile_context>

<pallas_src>
import functools
import math

import jax
import jax.numpy as jnp
from jax import lax
from jax.experimental import pallas as pl
from jax.experimental.pallas import tpu as pltpu

_INV_SQRT2 = 0.7071067811865476
_TARGET_DENSE_BLOCK_BYTES = 4 * 1024 * 1024     # small-g dense-vreg path
_TARGET_GENERAL_BLOCK_BYTES = 2 * 1024 * 1024   # general (g, spatial) path
_VMEM_LIMIT_BYTES = 48 * 1024 * 1024


def _cdiv(a, b):
    return -(-a // b)


def _round_up(x, m):
    return ((x + m - 1) // m) * m


def _gelu(y):
    # exact (erf-based) GELU, matching torch.nn.GELU() defaults
    return 0.5 * y * (1.0 + lax.erf(y * _INV_SQRT2))


# ----------------------------------------------------------------------------
# Tile choosers
# ----------------------------------------------------------------------------
def _choose_row_tile(r, g, b):
    """Dense path: block is (g, rt, 128) f32. Returns (rt, n_tiles, ragged)."""
    target = max(8, (_TARGET_DENSE_BLOCK_BYTES // (g * 128 * 4)) // 8 * 8)
    if b == 1 and r > 8:
        # guarantee >= 2 grid steps so v7x megacore has something to split
        target = min(target, max(8, _round_up(_cdiv(r, 2), 8)))
    if r <= target:
        return r, 1, False
    rt = min(target, (r // 8) * 8)
    if r % 8 == 0:
        # prefer a divisor of r (multiple of 8) to avoid the ragged last tile
        m, best, d = r // 8, 0, 1
        while d * d <= m:
            if m % d == 0:
                for cand in (d, m // d):
                    if cand * 8 <= target:
                        best = max(best, cand)
            d += 1
        if best * 8 >= target // 2:
            rt = best * 8
    n = _cdiv(r, rt)
    return rt, n, (n * rt != r)


def _choose_spatial_tile(s, g, b):
    """General path: block is (g, t) f32. Returns (t, n_tiles, ragged)."""
    gp = max(g, 8)
    target = max(128, (_TARGET_GENERAL_BLOCK_BYTES // (gp * 4)) // 128 * 128)
    if b == 1 and s > 128:
        target = min(target, max(128, _round_up(_cdiv(s, 2), 128)))
    if s <= target:
        return s, 1, False
    t = min(target, (s // 128) * 128)
    if s % 128 == 0:
        m, best, d = s // 128, 0, 1
        while d * d <= m:
            if m % d == 0:
                for cand in (d, m // d):
                    if cand * 128 <= target:
                        best = max(best, cand)
            d += 1
        if best * 128 >= target // 2:
            t = best * 128
    n = _cdiv(s, t)
    return t, n, (n * t != s)


# ----------------------------------------------------------------------------
# Dense-vreg path (small g, s % 128 == 0): x viewed as (b, g, r, 128)
# ----------------------------------------------------------------------------
def _stats_kernel_dense(x_ref, w_ref, b_ref, sum_ref, sq_ref, *,
                        g, rt, r_valid, need_mask):
    """Pass 1: conv + GELU, emit per-tile per-channel lane-vector partials."""
    if need_mask:
        row = pl.program_id(1) * rt + lax.broadcasted_iota(jnp.int32, (rt, 128), 0)
        valid = row < r_valid
    for o in range(g):
        acc = x_ref[0] * w_ref[o, 0]            # scalar-splat FMA on full vregs
        for i in range(1, g):
            acc = acc + x_ref[i] * w_ref[o, i]
        acc = acc + b_ref[o]
        y = _gelu(acc)
        if need_mask:
            y = jnp.where(valid, y, 0.0)        # select: safe even if pad is NaN
        sum_ref[o] = jnp.sum(y, axis=0)         # (128,) lane-vector partials
        sq_ref[o] = jnp.sum(y * y, axis=0)


def _apply_kernel_dense(x_ref, w_ref, b_ref, scale_ref, shift_ref, o_ref, *, g):
    """Pass 2: recompute conv + GELU, apply the BN affine, lane-dense store."""
    for o in range(g):
        acc = x_ref[0] * w_ref[o, 0]
        for i in range(1, g):
            acc = acc + x_ref[i] * w_ref[o, i]
        acc = acc + b_ref[o]
        y = _gelu(acc)
        o_ref[o] = y * scale_ref[o] + shift_ref[o]


def _forward_dense(x4, conv_w, conv_b, gamma, beta, eps, b, g, s):
    r = s // 128
    rt, n_r, need_mask = _choose_row_tile(r, g, b)

    w_s = conv_w.astype(jnp.float32)            # (g, g)  -> SMEM scalars
    b_s = conv_b.astype(jnp.float32)            # (g,)    -> SMEM scalars
    smem = pl.BlockSpec(memory_space=pltpu.MemorySpace.SMEM)
    cparams = pltpu.CompilerParams(
        dimension_semantics=("parallel", "parallel"),
        vmem_limit_bytes=_VMEM_LIMIT_BYTES)

    # --- pass 1: conv + GELU + per-tile partial channel sums (no y writeback) ---
    part_sum, part_sq = pl.pallas_call(
        functools.partial(_stats_kernel_dense, g=g, rt=rt, r_valid=r,
                          need_mask=need_mask),
        out_shape=(jax.ShapeDtypeStruct((b, n_r, g, 128), jnp.float32),
                   jax.ShapeDtypeStruct((b, n_r, g, 128), jnp.float32)),
        grid=(b, n_r),
        in_specs=[
            pl.BlockSpec((None, g, rt, 128), lambda bi, si: (bi, 0, si, 0)),
            smem,   # conv weight
            smem,   # conv bias
        ],
        out_specs=(
            pl.BlockSpec((None, None, g, 128), lambda bi, si: (bi, si, 0, 0)),
            pl.BlockSpec((None, None, g, 128), lambda bi, si: (bi, si, 0, 0)),
        ),
        compiler_params=cparams,
    )(x4, w_s, b_s)

    # --- batch-norm statistics (training mode: biased batch variance) ---
    n_elems = jnp.float32(b * s)
    mean = jnp.sum(part_sum, axis=(0, 1, 3)) / n_elems
    var = jnp.maximum(jnp.sum(part_sq, axis=(0, 1, 3)) / n_elems - mean * mean, 0.0)
    inv_std = lax.rsqrt(var + jnp.float32(eps))
    scale = gamma.astype(jnp.float32) * inv_std            # (g,)
    shift = beta.astype(jnp.float32) - mean * scale        # (g,)

    # --- pass 2: recompute conv + GELU, apply scale/shift, lane-dense output ---
    out4 = pl.pallas_call(
        functools.partial(_apply_kernel_dense, g=g),
        out_shape=jax.ShapeDtypeStruct((b, g, r, 128), jnp.float32),
        grid=(b, n_r),
        in_specs=[
            pl.BlockSpec((None, g, rt, 128), lambda bi, si: (bi, 0, si, 0)),
            smem, smem, smem, smem,
        ],
        out_specs=pl.BlockSpec((None, g, rt, 128), lambda bi, si: (bi, 0, si, 0)),
        compiler_params=cparams,
    )(x4, w_s, b_s, scale, shift)
    return out4


# ----------------------------------------------------------------------------
# General path: x viewed as (b, g, s), block (g, t_s); MXU matmul for g > 8
# ----------------------------------------------------------------------------
def _conv_gelu(x, w, bias, g, use_mxu):
    """y = GELU(W @ x + bias); x: (g, t), w: (g, g), bias: (g, 1)."""
    if use_mxu:
        y = jnp.dot(w, x, preferred_element_type=jnp.float32,
                    precision=lax.Precision.HIGHEST)
    else:
        y = w[:, 0:1] * x[0:1, :]
        for i in range(1, g):
            y = y + w[:, i:i + 1] * x[i:i + 1, :]
    return _gelu(y + bias)


def _stats_kernel(x_ref, w_ref, b_ref, sum_ref, sq_ref, *,
                  g, t_s, s_valid, need_mask, use_mxu):
    y = _conv_gelu(x_ref[...], w_ref[...], b_ref[...], g, use_mxu)
    if need_mask:
        col = pl.program_id(1) * t_s + lax.broadcasted_iota(jnp.int32, y.shape, 1)
        y = jnp.where(col < s_valid, y, 0.0)   # select: safe even if pad is NaN
    sum_ref[...] = jnp.sum(y, axis=1, keepdims=True)
    sq_ref[...] = jnp.sum(y * y, axis=1, keepdims=True)


def _apply_kernel(x_ref, w_ref, b_ref, scale_ref, shift_ref, o_ref, *, g, use_mxu):
    y = _conv_gelu(x_ref[...], w_ref[...], b_ref[...], g, use_mxu)
    # ragged last block: out-of-bounds columns are dropped by the pipeline
    o_ref[...] = (y * scale_ref[...] + shift_ref[...]).astype(o_ref.dtype)


def _forward_general(x3, conv_w, conv_b, gamma, beta, eps, b, g, s):
    t_s, n_s, need_mask = _choose_spatial_tile(s, g, b)
    use_mxu = g > 8

    w2 = conv_w.astype(jnp.float32)
    bias2 = conv_b.reshape(g, 1).astype(jnp.float32)
    cparams = pltpu.CompilerParams(
        dimension_semantics=("parallel", "parallel"),
        vmem_limit_bytes=_VMEM_LIMIT_BYTES)

    part_sum, part_sq = pl.pallas_call(
        functools.partial(_stats_kernel, g=g, t_s=t_s, s_valid=s,
                          need_mask=need_mask, use_mxu=use_mxu),
        out_shape=(jax.ShapeDtypeStruct((b, n_s, g, 1), jnp.float32),
                   jax.ShapeDtypeStruct((b, n_s, g, 1), jnp.float32)),
        grid=(b, n_s),
        in_specs=[
            pl.BlockSpec((None, g, t_s), lambda bi, si: (bi, 0, si)),
            pl.BlockSpec((g, g), lambda bi, si: (0, 0)),
            pl.BlockSpec((g, 1), lambda bi, si: (0, 0)),
        ],
        out_specs=(
            pl.BlockSpec((None, None, g, 1), lambda bi, si: (bi, si, 0, 0)),
            pl.BlockSpec((None, None, g, 1), lambda bi, si: (bi, si, 0, 0)),
        ),
        compiler_params=cparams,
    )(x3, w2, bias2)

    n_elems = jnp.float32(b * s)
    mean = jnp.sum(part_sum, axis=(0, 1, 3)) / n_elems
    var = jnp.maximum(jnp.sum(part_sq, axis=(0, 1, 3)) / n_elems - mean * mean, 0.0)
    inv_std = lax.rsqrt(var + jnp.float32(eps))
    scale = (gamma.astype(jnp.float32) * inv_std).reshape(g, 1)
    shift = beta.astype(jnp.float32).reshape(g, 1) - mean.reshape(g, 1) * scale

    out3 = pl.pallas_call(
        functools.partial(_apply_kernel, g=g, use_mxu=use_mxu),
        out_shape=jax.ShapeDtypeStruct((b, g, s), jnp.float32),
        grid=(b, n_s),
        in_specs=[
            pl.BlockSpec((None, g, t_s), lambda bi, si: (bi, 0, si)),
            pl.BlockSpec((g, g), lambda bi, si: (0, 0)),
            pl.BlockSpec((g, 1), lambda bi, si: (0, 0)),
            pl.BlockSpec((g, 1), lambda bi, si: (0, 0)),
            pl.BlockSpec((g, 1), lambda bi, si: (0, 0)),
        ],
        out_specs=pl.BlockSpec((None, g, t_s), lambda bi, si: (bi, 0, si)),
        compiler_params=cparams,
    )(x3, w2, bias2, scale, shift)
    return out3


# ----------------------------------------------------------------------------
# Public forward
# ----------------------------------------------------------------------------
@functools.partial(jax.jit, static_argnames=("eps",))
def pointwise_conv_forward(x, conv_w, conv_b, gamma, beta, eps=1e-5):
    """Forward of pointWiseConv.

    x:       (b, g, c, h, w) float32  (PyTorch NCDHW layout, kept throughout)
    conv_w:  (g, g)          float32  (Conv3d 1x1x1 weight, [out_ch, in_ch])
    conv_b:  (g,)            float32
    gamma:   (g,)            float32  BatchNorm3d weight
    beta:    (g,)            float32  BatchNorm3d bias
    Returns  (b, g, c, h, w) float32
    """
    b, g, c, h, w = x.shape
    s = c * h * w
    xf = x.astype(jnp.float32)
    if g <= 8 and s % 128 == 0:
        out = _forward_dense(xf.reshape(b, g, s // 128, 128),
                             conv_w, conv_b, gamma, beta, eps, b, g, s)
    else:
        out = _forward_general(xf.reshape(b, g, s),
                               conv_w, conv_b, gamma, beta, eps, b, g, s)
    return out.reshape(b, g, c, h, w)


# ----------------------------------------------------------------------------
# Test harness
# ----------------------------------------------------------------------------
def _reference(x, conv_w, conv_b, gamma, beta, eps=1e-5):
    b, g, c, h, w = x.shape
    x2 = jnp.transpose(x, (0, 2, 3, 4, 1)).reshape(-1, g)
    y = jnp.dot(x2, conv_w.T, precision=lax.Precision.HIGHEST) + conv_b
    y = 0.5 * y * (1.0 + lax.erf(y / jnp.sqrt(2.0)))
    mu = y.mean(axis=0)
    va = y.var(axis=0)
    ref = (y - mu) / jnp.sqrt(va + eps) * gamma + beta
    return jnp.transpose(ref.reshape(b, c, h, w, g), (0, 4, 1, 2, 3))


def _run_case(key, b, g, c, h, w, tol):
    k_x, k_w, k_b, k_g, k_be = jax.random.split(key, 5)
    x = jax.random.normal(k_x, (b, g, c, h, w), dtype=jnp.float32)
    bound = 1.0 / math.sqrt(float(g))            # Conv3d(g, g, 1) default init range
    conv_w = jax.random.uniform(k_w, (g, g), jnp.float32, -bound, bound)
    conv_b = jax.random.uniform(k_b, (g,), jnp.float32, -bound, bound)
    gamma = 1.0 + 0.1 * jax.random.normal(k_g, (g,), dtype=jnp.float32)
    beta = 0.1 * jax.random.normal(k_be, (g,), dtype=jnp.float32)

    out = jax.block_until_ready(pointwise_conv_forward(x, conv_w, conv_b, gamma, beta))
    assert out.shape == (b, g, c, h, w)

    ref = _reference(x, conv_w, conv_b, gamma, beta)
    err = float(jnp.max(jnp.abs(out - ref)))
    assert err < tol, f"max abs err {err} for case {(b, g, c, h, w)}"


if __name__ == "__main__":
    key = jax.random.PRNGKey(0)
    k1, k2 = jax.random.split(key)
    # small-g dense-vreg path (s % 128 == 0)
    _run_case(k1, 2, 4, 4, 8, 8, 2e-4)
    # general path: ragged spatial tiles (s = 147), b == 1 grid split
    _run_case(k2, 1, 8, 3, 7, 7, 2e-4)
    print("KERNEL_OK")
</pallas_src>

<mosaic_0001>
module attributes {stable_mosaic.version = 11 : i64} {
  func.func @_stats_kernel_dense(%arg0: i32, %arg1: i32, %arg2: memref<1x4x2x128xf32, #tpu.memory_space<vmem>>, %arg3: memref<4x4xf32, #tpu.memory_space<smem>>, %arg4: memref<4xf32, #tpu.memory_space<smem>>, %arg5: memref<1x1x4x128xf32, #tpu.memory_space<vmem>>, %arg6: memref<1x1x4x128xf32, #tpu.memory_space<vmem>>) attributes {dimension_semantics = [#tpu.dimension_semantics<parallel>, #tpu.dimension_semantics<parallel>], iteration_bounds = array<i64: 2, 1>, scalar_prefetch = 0 : i64, scratch_operands = 0 : i64, tpu.core_type = #tpu.core_type<tc>, window_params = [{transform_indices = @transform_0, window_bounds = array<i64: 1, 4, 2, 128>}, {transform_indices = @transform_1, window_bounds = array<i64: 4, 4>}, {transform_indices = @transform_2, window_bounds = array<i64: 4>}, {transform_indices = @transform_3, window_bounds = array<i64: 1, 1, 4, 128>}, {transform_indices = @transform_4, window_bounds = array<i64: 1, 1, 4, 128>}]} {
    %c0 = arith.constant 0 : index
    %c0_0 = arith.constant 0 : index
    %c0_1 = arith.constant 0 : index
    %c0_2 = arith.constant 0 : index
    %0 = vector.load %arg2[%c0, %c0_0, %c0_1, %c0_2] : memref<1x4x2x128xf32, #tpu.memory_space<vmem>>, vector<1x1x2x128xf32>
    %1 = vector.shape_cast %0 : vector<1x1x2x128xf32> to vector<2x128xf32>
    %c0_3 = arith.constant 0 : index
    %c0_4 = arith.constant 0 : index
    %2 = memref.load %arg3[%c0_3, %c0_4] : memref<4x4xf32, #tpu.memory_space<smem>>
    %3 = vector.broadcast %2 : f32 to vector<2x128xf32>
    %4 = arith.mulf %1, %3 : vector<2x128xf32>
    %c0_5 = arith.constant 0 : index
    %c1 = arith.constant 1 : index
    %c0_6 = arith.constant 0 : index
    %c0_7 = arith.constant 0 : index
    %5 = vector.load %arg2[%c0_5, %c1, %c0_6, %c0_7] : memref<1x4x2x128xf32, #tpu.memory_space<vmem>>, vector<1x1x2x128xf32>
    %6 = vector.shape_cast %5 : vector<1x1x2x128xf32> to vector<2x128xf32>
    %c0_8 = arith.constant 0 : index
    %c1_9 = arith.constant 1 : index
    %7 = memref.load %arg3[%c0_8, %c1_9] : memref<4x4xf32, #tpu.memory_space<smem>>
    %8 = vector.broadcast %7 : f32 to vector<2x128xf32>
    %9 = arith.mulf %6, %8 : vector<2x128xf32>
    %10 = arith.addf %4, %9 : vector<2x128xf32>
    %c0_10 = arith.constant 0 : index
    %c2 = arith.constant 2 : index
    %c0_11 = arith.constant 0 : index
    %c0_12 = arith.constant 0 : index
    %11 = vector.load %arg2[%c0_10, %c2, %c0_11, %c0_12] : memref<1x4x2x128xf32, #tpu.memory_space<vmem>>, vector<1x1x2x128xf32>
    %12 = vector.shape_cast %11 : vector<1x1x2x128xf32> to vector<2x128xf32>
    %c0_13 = arith.constant 0 : index
    %c2_14 = arith.constant 2 : index
    %13 = memref.load %arg3[%c0_13, %c2_14] : memref<4x4xf32, #tpu.memory_space<smem>>
    %14 = vector.broadcast %13 : f32 to vector<2x128xf32>
    %15 = arith.mulf %12, %14 : vector<2x128xf32>
    %16 = arith.addf %10, %15 : vector<2x128xf32>
    %c0_15 = arith.constant 0 : index
    %c3 = arith.constant 3 : index
    %c0_16 = arith.constant 0 : index
    %c0_17 = arith.constant 0 : index
    %17 = vector.load %arg2[%c0_15, %c3, %c0_16, %c0_17] : memref<1x4x2x128xf32, #tpu.memory_space<vmem>>, vector<1x1x2x128xf32>
    %18 = vector.shape_cast %17 : vector<1x1x2x128xf32> to vector<2x128xf32>
    %c0_18 = arith.constant 0 : index
    %c3_19 = arith.constant 3 : index
    %19 = memref.load %arg3[%c0_18, %c3_19] : memref<4x4xf32, #tpu.memory_space<smem>>
    %20 = vector.broadcast %19 : f32 to vector<2x128xf32>
    %21 = arith.mulf %18, %20 : vector<2x128xf32>
    %22 = arith.addf %16, %21 : vector<2x128xf32>
    %c0_20 = arith.constant 0 : index
    %23 = memref.load %arg4[%c0_20] : memref<4xf32, #tpu.memory_space<smem>>
    %24 = vector.broadcast %23 : f32 to vector<2x128xf32>
    %25 = arith.addf %22, %24 : vector<2x128xf32>
    %cst = arith.constant 5.000000e-01 : f32
    %26 = vector.broadcast %cst : f32 to vector<2x128xf32>
    %27 = arith.mulf %26, %25 : vector<2x128xf32>
    %cst_21 = arith.constant 0.707106769 : f32
    %28 = vector.broadcast %cst_21 : f32 to vector<2x128xf32>
    %29 = arith.mulf %25, %28 : vector<2x128xf32>
    %30 = math.erf %29 : vector<2x128xf32>
    %cst_22 = arith.constant 1.000000e+00 : f32
    %31 = vector.broadcast %cst_22 : f32 to vector<2x128xf32>
    %32 = arith.addf %31, %30 : vector<2x128xf32>
    %33 = arith.mulf %27, %32 : vector<2x128xf32>
    %cst_23 = arith.constant dense<0.000000e+00> : vector<128xf32>
    %34 = vector.multi_reduction <add>, %33, %cst_23 [0] : vector<2x128xf32> to vector<128xf32>
    %c0_24 = arith.constant 0 : index
    %c0_25 = arith.constant 0 : index
    %c0_26 = arith.constant 0 : index
    %c0_27 = arith.constant 0 : index
    %35 = vector.load %arg5[%c0_24, %c0_25, %c0_26, %c0_27] : memref<1x1x4x128xf32, #tpu.memory_space<vmem>>, vector<1x1x1x128xf32>
    %36 = vector.shape_cast %35 : vector<1x1x1x128xf32> to vector<128xf32>
    %37 = vector.shape_cast %34 : vector<128xf32> to vector<1x1x1x128xf32>
    tpu.vector_store %arg5[%c0_24, %c0_25, %c0_26, %c0_27], %37 {strides = array<i32>} : memref<1x1x4x128xf32, #tpu.memory_space<vmem>>, vector<1x1x1x128xf32>,
    %38 = arith.mulf %33, %33 : vector<2x128xf32>
    %cst_28 = arith.constant dense<0.000000e+00> : vector<128xf32>
    %39 = vector.multi_reduction <add>, %38, %cst_28 [0] : vector<2x128xf32> to vector<128xf32>
    %c0_29 = arith.constant 0 : index
    %c0_30 = arith.constant 0 : index
    %c0_31 = arith.constant 0 : index
    %c0_32 = arith.constant 0 : index
    %40 = vector.load %arg6[%c0_29, %c0_30, %c0_31, %c0_32] : memref<1x1x4x128xf32, #tpu.memory_space<vmem>>, vector<1x1x1x128xf32>
    %41 = vector.shape_cast %40 : vector<1x1x1x128xf32> to vector<128xf32>
    %42 = vector.shape_cast %39 : vector<128xf32> to vector<1x1x1x128xf32>
    tpu.vector_store %arg6[%c0_29, %c0_30, %c0_31, %c0_32], %42 {strides = array<i32>} : memref<1x1x4x128xf32, #tpu.memory_space<vmem>>, vector<1x1x1x128xf32>,
    %c0_33 = arith.constant 0 : index
    %c0_34 = arith.constant 0 : index
    %c0_35 = arith.constant 0 : index
    %c0_36 = arith.constant 0 : index
    %43 = vector.load %arg2[%c0_33, %c0_34, %c0_35, %c0_36] : memref<1x4x2x128xf32, #tpu.memory_space<vmem>>, vector<1x1x2x128xf32>
    %44 = vector.shape_cast %43 : vector<1x1x2x128xf32> to vector<2x128xf32>
    %c1_37 = arith.constant 1 : index
    %c0_38 = arith.constant 0 : index
    %45 = memref.load %arg3[%c1_37, %c0_38] : memref<4x4xf32, #tpu.memory_space<smem>>
    %46 = vector.broadcast %45 : f32 to vector<2x128xf32>
    %47 = arith.mulf %44, %46 : vector<2x128xf32>
    %c0_39 = arith.constant 0 : index
    %c1_40 = arith.constant 1 : index
    %c0_41 = arith.constant 0 : index
    %c0_42 = arith.constant 0 : index
    %48 = vector.load %arg2[%c0_39, %c1_40, %c0_41, %c0_42] : memref<1x4x2x128xf32, #tpu.memory_space<vmem>>, vector<1x1x2x128xf32>
    %49 = vector.shape_cast %48 : vector<1x1x2x128xf32> to vector<2x128xf32>
    %c1_43 = arith.constant 1 : index
    %c1_44 = arith.constant 1 : index
    %50 = memref.load %arg3[%c1_43, %c1_44] : memref<4x4xf32, #tpu.memory_space<smem>>
    %51 = vector.broadcast %50 : f32 to vector<2x128xf32>
    %52 = arith.mulf %49, %51 : vector<2x128xf32>
    %53 = arith.addf %47, %52 : vector<2x128xf32>
    %c0_45 = arith.constant 0 : index
    %c2_46 = arith.constant 2 : index
    %c0_47 = arith.constant 0 : index
    %c0_48 = arith.constant 0 : index
    %54 = vector.load %arg2[%c0_45, %c2_46, %c0_47, %c0_48] : memref<1x4x2x128xf32, #tpu.memory_space<vmem>>, vector<1x1x2x128xf32>
    %55 = vector.shape_cast %54 : vector<1x1x2x128xf32> to vector<2x128xf32>
    %c1_49 = arith.constant 1 : index
    %c2_50 = arith.constant 2 : index
    %56 = memref.load %arg3[%c1_49, %c2_50] : memref<4x4xf32, #tpu.memory_space<smem>>
    %57 = vector.broadcast %56 : f32 to vector<2x128xf32>
    %58 = arith.mulf %55, %57 : vector<2x128xf32>
    %59 = arith.addf %53, %58 : vector<2x128xf32>
    %c0_51 = arith.constant 0 : index
    %c3_52 = arith.constant 3 : index
    %c0_53 = arith.constant 0 : index
    %c0_54 = arith.constant 0 : index
    %60 = vector.load %arg2[%c0_51, %c3_52, %c0_53, %c0_54] : memref<1x4x2x128xf32, #tpu.memory_space<vmem>>, vector<1x1x2x128xf32>
    %61 = vector.shape_cast %60 : vector<1x1x2x128xf32> to vector<2x128xf32>
    %c1_55 = arith.constant 1 : index
    %c3_56 = arith.constant 3 : index
    %62 = memref.load %arg3[%c1_55, %c3_56] : memref<4x4xf32, #tpu.memory_space<smem>>
    %63 = vector.broadcast %62 : f32 to vector<2x128xf32>
    %64 = arith.mulf %61, %63 : vector<2x128xf32>
    %65 = arith.addf %59, %64 : vector<2x128xf32>
    %c1_57 = arith.constant 1 : index
    %66 = memref.load %arg4[%c1_57] : memref<4xf32, #tpu.memory_space<smem>>
    %67 = vector.broadcast %66 : f32 to vector<2x128xf32>
    %68 = arith.addf %65, %67 : vector<2x128xf32>
    %cst_58 = arith.constant 5.000000e-01 : f32
    %69 = vector.broadcast %cst_58 : f32 to vector<2x128xf32>
    %70 = arith.mulf %69, %68 : vector<2x128xf32>
    %cst_59 = arith.constant 0.707106769 : f32
    %71 = vector.broadcast %cst_59 : f32 to vector<2x128xf32>
    %72 = arith.mulf %68, %71 : vector<2x128xf32>
    %73 = math.erf %72 : vector<2x128xf32>
    %cst_60 = arith.constant 1.000000e+00 : f32
    %74 = vector.broadcast %cst_60 : f32 to vector<2x128xf32>
    %75 = arith.addf %74, %73 : vector<2x128xf32>
    %76 = arith.mulf %70, %75 : vector<2x128xf32>
    %cst_61 = arith.constant dense<0.000000e+00> : vector<128xf32>
    %77 = vector.multi_reduction <add>, %76, %cst_61 [0] : vector<2x128xf32> to vector<128xf32>
    %c0_62 = arith.constant 0 : index
    %c0_63 = arith.constant 0 : index
    %c1_64 = arith.constant 1 : index
    %c0_65 = arith.constant 0 : index
    %78 = vector.load %arg5[%c0_62, %c0_63, %c1_64, %c0_65] : memref<1x1x4x128xf32, #tpu.memory_space<vmem>>, vector<1x1x1x128xf32>
    %79 = vector.shape_cast %78 : vector<1x1x1x128xf32> to vector<128xf32>
    %80 = vector.shape_cast %77 : vector<128xf32> to vector<1x1x1x128xf32>
    tpu.vector_store %arg5[%c0_62, %c0_63, %c1_64, %c0_65], %80 {strides = array<i32>} : memref<1x1x4x128xf32, #tpu.memory_space<vmem>>, vector<1x1x1x128xf32>,
    %81 = arith.mulf %76, %76 : vector<2x128xf32>
    %cst_66 = arith.constant dense<0.000000e+00> : vector<128xf32>
    %82 = vector.multi_reduction <add>, %81, %cst_66 [0] : vector<2x128xf32> to vector<128xf32>
    %c0_67 = arith.constant 0 : index
    %c0_68 = arith.constant 0 : index
    %c1_69 = arith.constant 1 : index
    %c0_70 = arith.constant 0 : index
    %83 = vector.load %arg6[%c0_67, %c0_68, %c1_69, %c0_70] : memref<1x1x4x128xf32, #tpu.memory_space<vmem>>, vector<1x1x1x128xf32>
    %84 = vector.shape_cast %83 : vector<1x1x1x128xf32> to vector<128xf32>
    %85 = vector.shape_cast %82 : vector<128xf32> to vector<1x1x1x128xf32>
    tpu.vector_store %arg6[%c0_67, %c0_68, %c1_69, %c0_70], %85 {strides = array<i32>} : memref<1x1x4x128xf32, #tpu.memory_space<vmem>>, vector<1x1x1x128xf32>,
    %c0_71 = arith.constant 0 : index
    %c0_72 = arith.constant 0 : index
    %c0_73 = arith.constant 0 : index
    %c0_74 = arith.constant 0 : index
    %86 = vector.load %arg2[%c0_71, %c0_72, %c0_73, %c0_74] : memref<1x4x2x128xf32, #tpu.memory_space<vmem>>, vector<1x1x2x128xf32>
    %87 = vector.shape_cast %86 : vector<1x1x2x128xf32> to vector<2x128xf32>
    %c2_75 = arith.constant 2 : index
    %c0_76 = arith.constant 0 : index
    %88 = memref.load %arg3[%c2_75, %c0_76] : memref<4x4xf32, #tpu.memory_space<smem>>
    %89 = vector.broadcast %88 : f32 to vector<2x128xf32>
    %90 = arith.mulf %87, %89 : vector<2x128xf32>
    %c0_77 = arith.constant 0 : index
    %c1_78 = arith.constant 1 : index
    %c0_79 = arith.constant 0 : index
    %c0_80 = arith.constant 0 : index
    %91 = vector.load %arg2[%c0_77, %c1_78, %c0_79, %c0_80] : memref<1x4x2x128xf32, #tpu.memory_space<vmem>>, vector<1x1x2x128xf32>
    %92 = vector.shape_cast %91 : vector<1x1x2x128xf32> to vector<2x128xf32>
    %c2_81 = arith.constant 2 : index
    %c1_82 = arith.constant 1 : index
    %93 = memref.load %arg3[%c2_81, %c1_82] : memref<4x4xf32, #tpu.memory_space<smem>>
    %94 = vector.broadcast %93 : f32 to vector<2x128xf32>
    %95 = arith.mulf %92, %94 : vector<2x128xf32>
    %96 = arith.addf %90, %95 : vector<2x128xf32>
    %c0_83 = arith.constant 0 : index
    %c2_84 = arith.constant 2 : index
    %c0_85 = arith.constant 0 : index
    %c0_86 = arith.constant 0 : index
    %97 = vector.load %arg2[%c0_83, %c2_84, %c0_85, %c0_86] : memref<1x4x2x128xf32, #tpu.memory_space<vmem>>, vector<1x1x2x128xf32>
    %98 = vector.shape_cast %97 : vector<1x1x2x128xf32> to vector<2x128xf32>
    %c2_87 = arith.constant 2 : index
    %c2_88 = arith.constant 2 : index
    %99 = memref.load %arg3[%c2_87, %c2_88] : memref<4x4xf32, #tpu.memory_space<smem>>
    %100 = vector.broadcast %99 : f32 to vector<2x128xf32>
    %101 = arith.mulf %98, %100 : vector<2x128xf32>
    %102 = arith.addf %96, %101 : vector<2x128xf32>
    %c0_89 = arith.constant 0 : index
    %c3_90 = arith.constant 3 : index
    %c0_91 = arith.constant 0 : index
    %c0_92 = arith.constant 0 : index
    %103 = vector.load %arg2[%c0_89, %c3_90, %c0_91, %c0_92] : memref<1x4x2x128xf32, #tpu.memory_space<vmem>>, vector<1x1x2x128xf32>
    %104 = vector.shape_cast %103 : vector<1x1x2x128xf32> to vector<2x128xf32>
    %c2_93 = arith.constant 2 : index
    %c3_94 = arith.constant 3 : index
    %105 = memref.load %arg3[%c2_93, %c3_94] : memref<4x4xf32, #tpu.memory_space<smem>>
    %106 = vector.broadcast %105 : f32 to vector<2x128xf32>
    %107 = arith.mulf %104, %106 : vector<2x128xf32>
    %108 = arith.addf %102, %107 : vector<2x128xf32>
    %c2_95 = arith.constant 2 : index
    %109 = memref.load %arg4[%c2_95] : memref<4xf32, #tpu.memory_space<smem>>
    %110 = vector.broadcast %109 : f32 to vector<2x128xf32>
    %111 = arith.addf %108, %110 : vector<2x128xf32>
    %cst_96 = arith.constant 5.000000e-01 : f32
    %112 = vector.broadcast %cst_96 : f32 to vector<2x128xf32>
    %113 = arith.mulf %112, %111 : vector<2x128xf32>
    %cst_97 = arith.constant 0.707106769 : f32
    %114 = vector.broadcast %cst_97 : f32 to vector<2x128xf32>
    %115 = arith.mulf %111, %114 : vector<2x128xf32>
    %116 = math.erf %115 : vector<2x128xf32>
    %cst_98 = arith.constant 1.000000e+00 : f32
    %117 = vector.broadcast %cst_98 : f32 to vector<2x128xf32>
    %118 = arith.addf %117, %116 : vector<2x128xf32>
    %119 = arith.mulf %113, %118 : vector<2x128xf32>
    %cst_99 = arith.constant dense<0.000000e+00> : vector<128xf32>
    %120 = vector.multi_reduction <add>, %119, %cst_99 [0] : vector<2x128xf32> to vector<128xf32>
    %c0_100 = arith.constant 0 : index
    %c0_101 = arith.constant 0 : index
    %c2_102 = arith.constant 2 : index
    %c0_103 = arith.constant 0 : index
    %121 = vector.load %arg5[%c0_100, %c0_101, %c2_102, %c0_103] : memref<1x1x4x128xf32, #tpu.memory_space<vmem>>, vector<1x1x1x128xf32>
    %122 = vector.shape_cast %121 : vector<1x1x1x128xf32> to vector<128xf32>
    %123 = vector.shape_cast %120 : vector<128xf32> to vector<1x1x1x128xf32>
    tpu.vector_store %arg5[%c0_100, %c0_101, %c2_102, %c0_103], %123 {strides = array<i32>} : memref<1x1x4x128xf32, #tpu.memory_space<vmem>>, vector<1x1x1x128xf32>,
    %124 = arith.mulf %119, %119 : vector<2x128xf32>
    %cst_104 = arith.constant dense<0.000000e+00> : vector<128xf32>
    %125 = vector.multi_reduction <add>, %124, %cst_104 [0] : vector<2x128xf32> to vector<128xf32>
    %c0_105 = arith.constant 0 : index
    %c0_106 = arith.constant 0 : index
    %c2_107 = arith.constant 2 : index
    %c0_108 = arith.constant 0 : index
    %126 = vector.load %arg6[%c0_105, %c0_106, %c2_107, %c0_108] : memref<1x1x4x128xf32, #tpu.memory_space<vmem>>, vector<1x1x1x128xf32>
    %127 = vector.shape_cast %126 : vector<1x1x1x128xf32> to vector<128xf32>
    %128 = vector.shape_cast %125 : vector<128xf32> to vector<1x1x1x128xf32>
    tpu.vector_store %arg6[%c0_105, %c0_106, %c2_107, %c0_108], %128 {strides = array<i32>} : memref<1x1x4x128xf32, #tpu.memory_space<vmem>>, vector<1x1x1x128xf32>,
    %c0_109 = arith.constant 0 : index
    %c0_110 = arith.constant 0 : index
    %c0_111 = arith.constant 0 : index
    %c0_112 = arith.constant 0 : index
    %129 = vector.load %arg2[%c0_109, %c0_110, %c0_111, %c0_112] : memref<1x4x2x128xf32, #tpu.memory_space<vmem>>, vector<1x1x2x128xf32>
    %130 = vector.shape_cast %129 : vector<1x1x2x128xf32> to vector<2x128xf32>
    %c3_113 = arith.constant 3 : index
    %c0_114 = arith.constant 0 : index
    %131 = memref.load %arg3[%c3_113, %c0_114] : memref<4x4xf32, #tpu.memory_space<smem>>
    %132 = vector.broadcast %131 : f32 to vector<2x128xf32>
    %133 = arith.mulf %130, %132 : vector<2x128xf32>
    %c0_115 = arith.constant 0 : index
    %c1_116 = arith.constant 1 : index
    %c0_117 = arith.constant 0 : index
    %c0_118 = arith.constant 0 : index
    %134 = vector.load %arg2[%c0_115, %c1_116, %c0_117, %c0_118] : memref<1x4x2x128xf32, #tpu.memory_space<vmem>>, vector<1x1x2x128xf32>
    %135 = vector.shape_cast %134 : vector<1x1x2x128xf32> to vector<2x128xf32>
    %c3_119 = arith.constant 3 : index
    %c1_120 = arith.constant 1 : index
    %136 = memref.load %arg3[%c3_119, %c1_120] : memref<4x4xf32, #tpu.memory_space<smem>>
    %137 = vector.broadcast %136 : f32 to vector<2x128xf32>
    %138 = arith.mulf %135, %137 : vector<2x128xf32>
    %139 = arith.addf %133, %138 : vector<2x128xf32>
    %c0_121 = arith.constant 0 : index
    %c2_122 = arith.constant 2 : index
    %c0_123 = arith.constant 0 : index
    %c0_124 = arith.constant 0 : index
    %140 = vector.load %arg2[%c0_121, %c2_122, %c0_123, %c0_124] : memref<1x4x2x128xf32, #tpu.memory_space<vmem>>, vector<1x1x2x128xf32>
    %141 = vector.shape_cast %140 : vector<1x1x2x128xf32> to vector<2x128xf32>
    %c3_125 = arith.constant 3 : index
    %c2_126 = arith.constant 2 : index
    %142 = memref.load %arg3[%c3_125, %c2_126] : memref<4x4xf32, #tpu.memory_space<smem>>
    %143 = vector.broadcast %142 : f32 to vector<2x128xf32>
    %144 = arith.mulf %141, %143 : vector<2x128xf32>
    %145 = arith.addf %139, %144 : vector<2x128xf32>
    %c0_127 = arith.constant 0 : index
    %c3_128 = arith.constant 3 : index
    %c0_129 = arith.constant 0 : index
    %c0_130 = arith.constant 0 : index
    %146 = vector.load %arg2[%c0_127, %c3_128, %c0_129, %c0_130] : memref<1x4x2x128xf32, #tpu.memory_space<vmem>>, vector<1x1x2x128xf32>
    %147 = vector.shape_cast %146 : vector<1x1x2x128xf32> to vector<2x128xf32>
    %c3_131 = arith.constant 3 : index
    %c3_132 = arith.constant 3 : index
    %148 = memref.load %arg3[%c3_131, %c3_132] : memref<4x4xf32, #tpu.memory_space<smem>>
    %149 = vector.broadcast %148 : f32 to vector<2x128xf32>
    %150 = arith.mulf %147, %149 : vector<2x128xf32>
    %151 = arith.addf %145, %150 : vector<2x128xf32>
    %c3_133 = arith.constant 3 : index
    %152 = memref.load %arg4[%c3_133] : memref<4xf32, #tpu.memory_space<smem>>
    %153 = vector.broadcast %152 : f32 to vector<2x128xf32>
    %154 = arith.addf %151, %153 : vector<2x128xf32>
    %cst_134 = arith.constant 5.000000e-01 : f32
    %155 = vector.broadcast %cst_134 : f32 to vector<2x128xf32>
    %156 = arith.mulf %155, %154 : vector<2x128xf32>
    %cst_135 = arith.constant 0.707106769 : f32
    %157 = vector.broadcast %cst_135 : f32 to vector<2x128xf32>
    %158 = arith.mulf %154, %157 : vector<2x128xf32>
    %159 = math.erf %158 : vector<2x128xf32>
    %cst_136 = arith.constant 1.000000e+00 : f32
    %160 = vector.broadcast %cst_136 : f32 to vector<2x128xf32>
    %161 = arith.addf %160, %159 : vector<2x128xf32>
    %162 = arith.mulf %156, %161 : vector<2x128xf32>
    %cst_137 = arith.constant dense<0.000000e+00> : vector<128xf32>
    %163 = vector.multi_reduction <add>, %162, %cst_137 [0] : vector<2x128xf32> to vector<128xf32>
    %c0_138 = arith.constant 0 : index
    %c0_139 = arith.constant 0 : index
    %c3_140 = arith.constant 3 : index
    %c0_141 = arith.constant 0 : index
    %164 = vector.load %arg5[%c0_138, %c0_139, %c3_140, %c0_141] : memref<1x1x4x128xf32, #tpu.memory_space<vmem>>, vector<1x1x1x128xf32>
    %165 = vector.shape_cast %164 : vector<1x1x1x128xf32> to vector<128xf32>
    %166 = vector.shape_cast %163 : vector<128xf32> to vector<1x1x1x128xf32>
    tpu.vector_store %arg5[%c0_138, %c0_139, %c3_140, %c0_141], %166 {strides = array<i32>} : memref<1x1x4x128xf32, #tpu.memory_space<vmem>>, vector<1x1x1x128xf32>,
    %167 = arith.mulf %162, %162 : vector<2x128xf32>
    %cst_142 = arith.constant dense<0.000000e+00> : vector<128xf32>
    %168 = vector.multi_reduction <add>, %167, %cst_142 [0] : vector<2x128xf32> to vector<128xf32>
    %c0_143 = arith.constant 0 : index
    %c0_144 = arith.constant 0 : index
    %c3_145 = arith.constant 3 : index
    %c0_146 = arith.constant 0 : index
    %169 = vector.load %arg6[%c0_143, %c0_144, %c3_145, %c0_146] : memref<1x1x4x128xf32, #tpu.memory_space<vmem>>, vector<1x1x1x128xf32>
    %170 = vector.shape_cast %169 : vector<1x1x1x128xf32> to vector<128xf32>
    %171 = vector.shape_cast %168 : vector<128xf32> to vector<1x1x1x128xf32>
    tpu.vector_store %arg6[%c0_143, %c0_144, %c3_145, %c0_146], %171 {strides = array<i32>} : memref<1x1x4x128xf32, #tpu.memory_space<vmem>>, vector<1x1x1x128xf32>,
    return
  }
  func.func @transform_0(%arg0: i32, %arg1: i32) -> (i32, i32, i32, i32) {
    %c0_i32 = arith.constant 0 : i32
    %c0_i32_0 = arith.constant 0 : i32
    %c0_i32_1 = arith.constant 0 : i32
    return %arg0, %c0_i32, %arg1, %c0_i32_0 : i32, i32, i32, i32
  }
  func.func @transform_1(%arg0: i32, %arg1: i32) -> (i32, i32) {
    %c0_i32 = arith.constant 0 : i32
    %c0_i32_0 = arith.constant 0 : i32
    %c0_i32_1 = arith.constant 0 : i32
    return %c0_i32, %c0_i32_0 : i32, i32
  }
  func.func @transform_2(%arg0: i32, %arg1: i32) -> i32 {
    %c0_i32 = arith.constant 0 : i32
    %c0_i32_0 = arith.constant 0 : i32
    return %c0_i32 : i32
  }
  func.func @transform_3(%arg0: i32, %arg1: i32) -> (i32, i32, i32, i32) {
    %c0_i32 = arith.constant 0 : i32
    %c0_i32_0 = arith.constant 0 : i32
    %c0_i32_1 = arith.constant 0 : i32
    return %arg0, %arg1, %c0_i32, %c0_i32_0 : i32, i32, i32, i32
  }
  func.func @transform_4(%arg0: i32, %arg1: i32) -> (i32, i32, i32, i32) {
    %c0_i32 = arith.constant 0 : i32
    %c0_i32_0 = arith.constant 0 : i32
    %c0_i32_1 = arith.constant 0 : i32
    return %arg0, %arg1, %c0_i32, %c0_i32_0 : i32, i32, i32, i32
  }
}

module attributes {stable_mosaic.version = 11 : i64} {
  func.func @_apply_kernel_dense(%arg0: i32, %arg1: i32, %arg2: memref<1x4x2x128xf32, #tpu.memory_space<vmem>>, %arg3: memref<4x4xf32, #tpu.memory_space<smem>>, %arg4: memref<4xf32, #tpu.memory_space<smem>>, %arg5: memref<4xf32, #tpu.memory_space<smem>>, %arg6: memref<4xf32, #tpu.memory_space<smem>>, %arg7: memref<1x4x2x128xf32, #tpu.memory_space<vmem>>) attributes {dimension_semantics = [#tpu.dimension_semantics<parallel>, #tpu.dimension_semantics<parallel>], iteration_bounds = array<i64: 2, 1>, scalar_prefetch = 0 : i64, scratch_operands = 0 : i64, tpu.core_type = #tpu.core_type<tc>, window_params = [{transform_indices = @transform_0, window_bounds = array<i64: 1, 4, 2, 128>}, {transform_indices = @transform_1, window_bounds = array<i64: 4, 4>}, {transform_indices = @transform_2, window_bounds = array<i64: 4>}, {transform_indices = @transform_3, window_bounds = array<i64: 4>}, {transform_indices = @transform_4, window_bounds = array<i64: 4>}, {transform_indices = @transform_5, window_bounds = array<i64: 1, 4, 2, 128>}]} {
    %c0 = arith.constant 0 : index
    %c0_0 = arith.constant 0 : index
    %c0_1 = arith.constant 0 : index
    %c0_2 = arith.constant 0 : index
    %0 = vector.load %arg2[%c0, %c0_0, %c0_1, %c0_2] : memref<1x4x2x128xf32, #tpu.memory_space<vmem>>, vector<1x1x2x128xf32>
    %1 = vector.shape_cast %0 : vector<1x1x2x128xf32> to vector<2x128xf32>
    %c0_3 = arith.constant 0 : index
    %c0_4 = arith.constant 0 : index
    %2 = memref.load %arg3[%c0_3, %c0_4] : memref<4x4xf32, #tpu.memory_space<smem>>
    %3 = vector.broadcast %2 : f32 to vector<2x128xf32>
    %4 = arith.mulf %1, %3 : vector<2x128xf32>
    %c0_5 = arith.constant 0 : index
    %c1 = arith.constant 1 : index
    %c0_6 = arith.constant 0 : index
    %c0_7 = arith.constant 0 : index
    %5 = vector.load %arg2[%c0_5, %c1, %c0_6, %c0_7] : memref<1x4x2x128xf32, #tpu.memory_space<vmem>>, vector<1x1x2x128xf32>
    %6 = vector.shape_cast %5 : vector<1x1x2x128xf32> to vector<2x128xf32>
    %c0_8 = arith.constant 0 : index
    %c1_9 = arith.constant 1 : index
    %7 = memref.load %arg3[%c0_8, %c1_9] : memref<4x4xf32, #tpu.memory_space<smem>>
    %8 = vector.broadcast %7 : f32 to vector<2x128xf32>
    %9 = arith.mulf %6, %8 : vector<2x128xf32>
    %10 = arith.addf %4, %9 : vector<2x128xf32>
    %c0_10 = arith.constant 0 : index
    %c2 = arith.constant 2 : index
    %c0_11 = arith.constant 0 : index
    %c0_12 = arith.constant 0 : index
    %11 = vector.load %arg2[%c0_10, %c2, %c0_11, %c0_12] : memref<1x4x2x128xf32, #tpu.memory_space<vmem>>, vector<1x1x2x128xf32>
    %12 = vector.shape_cast %11 : vector<1x1x2x128xf32> to vector<2x128xf32>
    %c0_13 = arith.constant 0 : index
    %c2_14 = arith.constant 2 : index
    %13 = memref.load %arg3[%c0_13, %c2_14] : memref<4x4xf32, #tpu.memory_space<smem>>
    %14 = vector.broadcast %13 : f32 to vector<2x128xf32>
    %15 = arith.mulf %12, %14 : vector<2x128xf32>
    %16 = arith.addf %10, %15 : vector<2x128xf32>
    %c0_15 = arith.constant 0 : index
    %c3 = arith.constant 3 : index
    %c0_16 = arith.constant 0 : index
    %c0_17 = arith.constant 0 : index
    %17 = vector.load %arg2[%c0_15, %c3, %c0_16, %c0_17] : memref<1x4x2x128xf32, #tpu.memory_space<vmem>>, vector<1x1x2x128xf32>
    %18 = vector.shape_cast %17 : vector<1x1x2x128xf32> to vector<2x128xf32>
    %c0_18 = arith.constant 0 : index
    %c3_19 = arith.constant 3 : index
    %19 = memref.load %arg3[%c0_18, %c3_19] : memref<4x4xf32, #tpu.memory_space<smem>>
    %20 = vector.broadcast %19 : f32 to vector<2x128xf32>
    %21 = arith.mulf %18, %20 : vector<2x128xf32>
    %22 = arith.addf %16, %21 : vector<2x128xf32>
    %c0_20 = arith.constant 0 : index
    %23 = memref.load %arg4[%c0_20] : memref<4xf32, #tpu.memory_space<smem>>
    %24 = vector.broadcast %23 : f32 to vector<2x128xf32>
    %25 = arith.addf %22, %24 : vector<2x128xf32>
    %cst = arith.constant 5.000000e-01 : f32
    %26 = vector.broadcast %cst : f32 to vector<2x128xf32>
    %27 = arith.mulf %26, %25 : vector<2x128xf32>
    %cst_21 = arith.constant 0.707106769 : f32
    %28 = vector.broadcast %cst_21 : f32 to vector<2x128xf32>
    %29 = arith.mulf %25, %28 : vector<2x128xf32>
    %30 = math.erf %29 : vector<2x128xf32>
    %cst_22 = arith.constant 1.000000e+00 : f32
    %31 = vector.broadcast %cst_22 : f32 to vector<2x128xf32>
    %32 = arith.addf %31, %30 : vector<2x128xf32>
    %33 = arith.mulf %27, %32 : vector<2x128xf32>
    %c0_23 = arith.constant 0 : index
    %34 = memref.load %arg5[%c0_23] : memref<4xf32, #tpu.memory_space<smem>>
    %35 = vector.broadcast %34 : f32 to vector<2x128xf32>
    %36 = arith.mulf %33, %35 : vector<2x128xf32>
    %c0_24 = arith.constant 0 : index
    %37 = memref.load %arg6[%c0_24] : memref<4xf32, #tpu.memory_space<smem>>
    %38 = vector.broadcast %37 : f32 to vector<2x128xf32>
    %39 = arith.addf %36, %38 : vector<2x128xf32>
    %c0_25 = arith.constant 0 : index
    %c0_26 = arith.constant 0 : index
    %c0_27 = arith.constant 0 : index
    %c0_28 = arith.constant 0 : index
    %40 = vector.load %arg7[%c0_25, %c0_26, %c0_27, %c0_28] : memref<1x4x2x128xf32, #tpu.memory_space<vmem>>, vector<1x1x2x128xf32>
    %41 = vector.shape_cast %40 : vector<1x1x2x128xf32> to vector<2x128xf32>
    %42 = vector.shape_cast %39 : vector<2x128xf32> to vector<1x1x2x128xf32>
    tpu.vector_store %arg7[%c0_25, %c0_26, %c0_27, %c0_28], %42 {strides = array<i32>} : memref<1x4x2x128xf32, #tpu.memory_space<vmem>>, vector<1x1x2x128xf32>,
    %c0_29 = arith.constant 0 : index
    %c0_30 = arith.constant 0 : index
    %c0_31 = arith.constant 0 : index
    %c0_32 = arith.constant 0 : index
    %43 = vector.load %arg2[%c0_29, %c0_30, %c0_31, %c0_32] : memref<1x4x2x128xf32, #tpu.memory_space<vmem>>, vector<1x1x2x128xf32>
    %44 = vector.shape_cast %43 : vector<1x1x2x128xf32> to vector<2x128xf32>
    %c1_33 = arith.constant 1 : index
    %c0_34 = arith.constant 0 : index
    %45 = memref.load %arg3[%c1_33, %c0_34] : memref<4x4xf32, #tpu.memory_space<smem>>
    %46 = vector.broadcast %45 : f32 to vector<2x128xf32>
    %47 = arith.mulf %44, %46 : vector<2x128xf32>
    %c0_35 = arith.constant 0 : index
    %c1_36 = arith.constant 1 : index
    %c0_37 = arith.constant 0 : index
    %c0_38 = arith.constant 0 : index
    %48 = vector.load %arg2[%c0_35, %c1_36, %c0_37, %c0_38] : memref<1x4x2x128xf32, #tpu.memory_space<vmem>>, vector<1x1x2x128xf32>
    %49 = vector.shape_cast %48 : vector<1x1x2x128xf32> to vector<2x128xf32>
    %c1_39 = arith.constant 1 : index
    %c1_40 = arith.constant 1 : index
    %50 = memref.load %arg3[%c1_39, %c1_40] : memref<4x4xf32, #tpu.memory_space<smem>>
    %51 = vector.broadcast %50 : f32 to vector<2x128xf32>
    %52 = arith.mulf %49, %51 : vector<2x128xf32>
    %53 = arith.addf %47, %52 : vector<2x128xf32>
    %c0_41 = arith.constant 0 : index
    %c2_42 = arith.constant 2 : index
    %c0_43 = arith.constant 0 : index
    %c0_44 = arith.constant 0 : index
    %54 = vector.load %arg2[%c0_41, %c2_42, %c0_43, %c0_44] : memref<1x4x2x128xf32, #tpu.memory_space<vmem>>, vector<1x1x2x128xf32>
    %55 = vector.shape_cast %54 : vector<1x1x2x128xf32> to vector<2x128xf32>
    %c1_45 = arith.constant 1 : index
    %c2_46 = arith.constant 2 : index
    %56 = memref.load %arg3[%c1_45, %c2_46] : memref<4x4xf32, #tpu.memory_space<smem>>
    %57 = vector.broadcast %56 : f32 to vector<2x128xf32>
    %58 = arith.mulf %55, %57 : vector<2x128xf32>
    %59 = arith.addf %53, %58 : vector<2x128xf32>
    %c0_47 = arith.constant 0 : index
    %c3_48 = arith.constant 3 : index
    %c0_49 = arith.constant 0 : index
    %c0_50 = arith.constant 0 : index
    %60 = vector.load %arg2[%c0_47, %c3_48, %c0_49, %c0_50] : memref<1x4x2x128xf32, #tpu.memory_space<vmem>>, vector<1x1x2x128xf32>
    %61 = vector.shape_cast %60 : vector<1x1x2x128xf32> to vector<2x128xf32>
    %c1_51 = arith.constant 1 : index
    %c3_52 = arith.constant 3 : index
    %62 = memref.load %arg3[%c1_51, %c3_52] : memref<4x4xf32, #tpu.memory_space<smem>>
    %63 = vector.broadcast %62 : f32 to vector<2x128xf32>
    %64 = arith.mulf %61, %63 : vector<2x128xf32>
    %65 = arith.addf %59, %64 : vector<2x128xf32>
    %c1_53 = arith.constant 1 : index
    %66 = memref.load %arg4[%c1_53] : memref<4xf32, #tpu.memory_space<smem>>
    %67 = vector.broadcast %66 : f32 to vector<2x128xf32>
    %68 = arith.addf %65, %67 : vector<2x128xf32>
    %cst_54 = arith.constant 5.000000e-01 : f32
    %69 = vector.broadcast %cst_54 : f32 to vector<2x128xf32>
    %70 = arith.mulf %69, %68 : vector<2x128xf32>
    %cst_55 = arith.constant 0.707106769 : f32
    %71 = vector.broadcast %cst_55 : f32 to vector<2x128xf32>
    %72 = arith.mulf %68, %71 : vector<2x128xf32>
    %73 = math.erf %72 : vector<2x128xf32>
    %cst_56 = arith.constant 1.000000e+00 : f32
    %74 = vector.broadcast %cst_56 : f32 to vector<2x128xf32>
    %75 = arith.addf %74, %73 : vector<2x128xf32>
    %76 = arith.mulf %70, %75 : vector<2x128xf32>
    %c1_57 = arith.constant 1 : index
    %77 = memref.load %arg5[%c1_57] : memref<4xf32, #tpu.memory_space<smem>>
    %78 = vector.broadcast %77 : f32 to vector<2x128xf32>
    %79 = arith.mulf %76, %78 : vector<2x128xf32>
    %c1_58 = arith.constant 1 : index
    %80 = memref.load %arg6[%c1_58] : memref<4xf32, #tpu.memory_space<smem>>
    %81 = vector.broadcast %80 : f32 to vector<2x128xf32>
    %82 = arith.addf %79, %81 : vector<2x128xf32>
    %c0_59 = arith.constant 0 : index
    %c1_60 = arith.constant 1 : index
    %c0_61 = arith.constant 0 : index
    %c0_62 = arith.constant 0 : index
    %83 = vector.load %arg7[%c0_59, %c1_60, %c0_61, %c0_62] : memref<1x4x2x128xf32, #tpu.memory_space<vmem>>, vector<1x1x2x128xf32>
    %84 = vector.shape_cast %83 : vector<1x1x2x128xf32> to vector<2x128xf32>
    %85 = vector.shape_cast %82 : vector<2x128xf32> to vector<1x1x2x128xf32>
    tpu.vector_store %arg7[%c0_59, %c1_60, %c0_61, %c0_62], %85 {strides = array<i32>} : memref<1x4x2x128xf32, #tpu.memory_space<vmem>>, vector<1x1x2x128xf32>,
    %c0_63 = arith.constant 0 : index
    %c0_64 = arith.constant 0 : index
    %c0_65 = arith.constant 0 : index
    %c0_66 = arith.constant 0 : index
    %86 = vector.load %arg2[%c0_63, %c0_64, %c0_65, %c0_66] : memref<1x4x2x128xf32, #tpu.memory_space<vmem>>, vector<1x1x2x128xf32>
    %87 = vector.shape_cast %86 : vector<1x1x2x128xf32> to vector<2x128xf32>
    %c2_67 = arith.constant 2 : index
    %c0_68 = arith.constant 0 : index
    %88 = memref.load %arg3[%c2_67, %c0_68] : memref<4x4xf32, #tpu.memory_space<smem>>
    %89 = vector.broadcast %88 : f32 to vector<2x128xf32>
    %90 = arith.mulf %87, %89 : vector<2x128xf32>
    %c0_69 = arith.constant 0 : index
    %c1_70 = arith.constant 1 : index
    %c0_71 = arith.constant 0 : index
    %c0_72 = arith.constant 0 : index
    %91 = vector.load %arg2[%c0_69, %c1_70, %c0_71, %c0_72] : memref<1x4x2x128xf32, #tpu.memory_space<vmem>>, vector<1x1x2x128xf32>
    %92 = vector.shape_cast %91 : vector<1x1x2x128xf32> to vector<2x128xf32>
    %c2_73 = arith.constant 2 : index
    %c1_74 = arith.constant 1 : index
    %93 = memref.load %arg3[%c2_73, %c1_74] : memref<4x4xf32, #tpu.memory_space<smem>>
    %94 = vector.broadcast %93 : f32 to vector<2x128xf32>
    %95 = arith.mulf %92, %94 : vector<2x128xf32>
    %96 = arith.addf %90, %95 : vector<2x128xf32>
    %c0_75 = arith.constant 0 : index
    %c2_76 = arith.constant 2 : index
    %c0_77 = arith.constant 0 : index
    %c0_78 = arith.constant 0 : index
    %97 = vector.load %arg2[%c0_75, %c2_76, %c0_77, %c0_78] : memref<1x4x2x128xf32, #tpu.memory_space<vmem>>, vector<1x1x2x128xf32>
    %98 = vector.shape_cast %97 : vector<1x1x2x128xf32> to vector<2x128xf32>
    %c2_79 = arith.constant 2 : index
    %c2_80 = arith.constant 2 : index
    %99 = memref.load %arg3[%c2_79, %c2_80] : memref<4x4xf32, #tpu.memory_space<smem>>
    %100 = vector.broadcast %99 : f32 to vector<2x128xf32>
    %101 = arith.mulf %98, %100 : vector<2x128xf32>
    %102 = arith.addf %96, %101 : vector<2x128xf32>
    %c0_81 = arith.constant 0 : index
    %c3_82 = arith.constant 3 : index
    %c0_83 = arith.constant 0 : index
    %c0_84 = arith.constant 0 : index
    %103 = vector.load %arg2[%c0_81, %c3_82, %c0_83, %c0_84] : memref<1x4x2x128xf32, #tpu.memory_space<vmem>>, vector<1x1x2x128xf32>
    %104 = vector.shape_cast %103 : vector<1x1x2x128xf32> to vector<2x128xf32>
    %c2_85 = arith.constant 2 : index
    %c3_86 = arith.constant 3 : index
    %105 = memref.load %arg3[%c2_85, %c3_86] : memref<4x4xf32, #tpu.memory_space<smem>>
    %106 = vector.broadcast %105 : f32 to vector<2x128xf32>
    %107 = arith.mulf %104, %106 : vector<2x128xf32>
    %108 = arith.addf %102, %107 : vector<2x128xf32>
    %c2_87 = arith.constant 2 : index
    %109 = memref.load %arg4[%c2_87] : memref<4xf32, #tpu.memory_space<smem>>
    %110 = vector.broadcast %109 : f32 to vector<2x128xf32>
    %111 = arith.addf %108, %110 : vector<2x128xf32>
    %cst_88 = arith.constant 5.000000e-01 : f32
    %112 = vector.broadcast %cst_88 : f32 to vector<2x128xf32>
    %113 = arith.mulf %112, %111 : vector<2x128xf32>
    %cst_89 = arith.constant 0.707106769 : f32
    %114 = vector.broadcast %cst_89 : f32 to vector<2x128xf32>
    %115 = arith.mulf %111, %114 : vector<2x128xf32>
    %116 = math.erf %115 : vector<2x128xf32>
    %cst_90 = arith.constant 1.000000e+00 : f32
    %117 = vector.broadcast %cst_90 : f32 to vector<2x128xf32>
    %118 = arith.addf %117, %116 : vector<2x128xf32>
    %119 = arith.mulf %113, %118 : vector<2x128xf32>
    %c2_91 = arith.constant 2 : index
    %120 = memref.load %arg5[%c2_91] : memref<4xf32, #tpu.memory_space<smem>>
    %121 = vector.broadcast %120 : f32 to vector<2x128xf32>
    %122 = arith.mulf %119, %121 : vector<2x128xf32>
    %c2_92 = arith.constant 2 : index
    %123 = memref.load %arg6[%c2_92] : memref<4xf32, #tpu.memory_space<smem>>
    %124 = vector.broadcast %123 : f32 to vector<2x128xf32>
    %125 = arith.addf %122, %124 : vector<2x128xf32>
    %c0_93 = arith.constant 0 : index
    %c2_94 = arith.constant 2 : index
    %c0_95 = arith.constant 0 : index
    %c0_96 = arith.constant 0 : index
    %126 = vector.load %arg7[%c0_93, %c2_94, %c0_95, %c0_96] : memref<1x4x2x128xf32, #tpu.memory_space<vmem>>, vector<1x1x2x128xf32>
    %127 = vector.shape_cast %126 : vector<1x1x2x128xf32> to vector<2x128xf32>
    %128 = vector.shape_cast %125 : vector<2x128xf32> to vector<1x1x2x128xf32>
    tpu.vector_store %arg7[%c0_93, %c2_94, %c0_95, %c0_96], %128 {strides = array<i32>} : memref<1x4x2x128xf32, #tpu.memory_space<vmem>>, vector<1x1x2x128xf32>,
    %c0_97 = arith.constant 0 : index
    %c0_98 = arith.constant 0 : index
    %c0_99 = arith.constant 0 : index
    %c0_100 = arith.constant 0 : index
    %129 = vector.load %arg2[%c0_97, %c0_98, %c0_99, %c0_100] : memref<1x4x2x128xf32, #tpu.memory_space<vmem>>, vector<1x1x2x128xf32>
    %130 = vector.shape_cast %129 : vector<1x1x2x128xf32> to vector<2x128xf32>
    %c3_101 = arith.constant 3 : index
    %c0_102 = arith.constant 0 : index
    %131 = memref.load %arg3[%c3_101, %c0_102] : memref<4x4xf32, #tpu.memory_space<smem>>
    %132 = vector.broadcast %131 : f32 to vector<2x128xf32>
    %133 = arith.mulf %130, %132 : vector<2x128xf32>
    %c0_103 = arith.constant 0 : index
    %c1_104 = arith.constant 1 : index
    %c0_105 = arith.constant 0 : index
    %c0_106 = arith.constant 0 : index
    %134 = vector.load %arg2[%c0_103, %c1_104, %c0_105, %c0_106] : memref<1x4x2x128xf32, #tpu.memory_space<vmem>>, vector<1x1x2x128xf32>
    %135 = vector.shape_cast %134 : vector<1x1x2x128xf32> to vector<2x128xf32>
    %c3_107 = arith.constant 3 : index
    %c1_108 = arith.constant 1 : index
    %136 = memref.load %arg3[%c3_107, %c1_108] : memref<4x4xf32, #tpu.memory_space<smem>>
    %137 = vector.broadcast %136 : f32 to vector<2x128xf32>
    %138 = arith.mulf %135, %137 : vector<2x128xf32>
    %139 = arith.addf %133, %138 : vector<2x128xf32>
    %c0_109 = arith.constant 0 : index
    %c2_110 = arith.constant 2 : index
    %c0_111 = arith.constant 0 : index
    %c0_112 = arith.constant 0 : index
    %140 = vector.load %arg2[%c0_109, %c2_110, %c0_111, %c0_112] : memref<1x4x2x128xf32, #tpu.memory_space<vmem>>, vector<1x1x2x128xf32>
    %141 = vector.shape_cast %140 : vector<1x1x2x128xf32> to vector<2x128xf32>
    %c3_113 = arith.constant 3 : index
    %c2_114 = arith.constant 2 : index
    %142 = memref.load %arg3[%c3_113, %c2_114] : memref<4x4xf32, #tpu.memory_space<smem>>
    %143 = vector.broadcast %142 : f32 to vector<2x128xf32>
    %144 = arith.mulf %141, %143 : vector<2x128xf32>
    %145 = arith.addf %139, %144 : vector<2x128xf32>
    %c0_115 = arith.constant 0 : index
    %c3_116 = arith.constant 3 : index
    %c0_117 = arith.constant 0 : index
    %c0_118 = arith.constant 0 : index
    %146 = vector.load %arg2[%c0_115, %c3_116, %c0_117, %c0_118] : memref<1x4x2x128xf32, #tpu.memory_space<vmem>>, vector<1x1x2x128xf32>
    %147 = vector.shape_cast %146 : vector<1x1x2x128xf32> to vector<2x128xf32>
    %c3_119 = arith.constant 3 : index
    %c3_120 = arith.constant 3 : index
    %148 = memref.load %arg3[%c3_119, %c3_120] : memref<4x4xf32, #tpu.memory_space<smem>>
    %149 = vector.broadcast %148 : f32 to vector<2x128xf32>
    %150 = arith.mulf %147, %149 : vector<2x128xf32>
    %151 = arith.addf %145, %150 : vector<2x128xf32>
    %c3_121 = arith.constant 3 : index
    %152 = memref.load %arg4[%c3_121] : memref<4xf32, #tpu.memory_space<smem>>
    %153 = vector.broadcast %152 : f32 to vector<2x128xf32>
    %154 = arith.addf %151, %153 : vector<2x128xf32>
    %cst_122 = arith.constant 5.000000e-01 : f32
    %155 = vector.broadcast %cst_122 : f32 to vector<2x128xf32>
    %156 = arith.mulf %155, %154 : vector<2x128xf32>
    %cst_123 = arith.constant 0.707106769 : f32
    %157 = vector.broadcast %cst_123 : f32 to vector<2x128xf32>
    %158 = arith.mulf %154, %157 : vector<2x128xf32>
    %159 = math.erf %158 : vector<2x128xf32>
    %cst_124 = arith.constant 1.000000e+00 : f32
    %160 = vector.broadcast %cst_124 : f32 to vector<2x128xf32>
    %161 = arith.addf %160, %159 : vector<2x128xf32>
    %162 = arith.mulf %156, %161 : vector<2x128xf32>
    %c3_125 = arith.constant 3 : index
    %163 = memref.load %arg5[%c3_125] : memref<4xf32, #tpu.memory_space<smem>>
    %164 = vector.broadcast %163 : f32 to vector<2x128xf32>
    %165 = arith.mulf %162, %164 : vector<2x128xf32>
    %c3_126 = arith.constant 3 : index
    %166 = memref.load %arg6[%c3_126] : memref<4xf32, #tpu.memory_space<smem>>
    %167 = vector.broadcast %166 : f32 to vector<2x128xf32>
    %168 = arith.addf %165, %167 : vector<2x128xf32>
    %c0_127 = arith.constant 0 : index
    %c3_128 = arith.constant 3 : index
    %c0_129 = arith.constant 0 : index
    %c0_130 = arith.constant 0 : index
    %169 = vector.load %arg7[%c0_127, %c3_128, %c0_129, %c0_130] : memref<1x4x2x128xf32, #tpu.memory_space<vmem>>, vector<1x1x2x128xf32>
    %170 = vector.shape_cast %169 : vector<1x1x2x128xf32> to vector<2x128xf32>
    %171 = vector.shape_cast %168 : vector<2x128xf32> to vector<1x1x2x128xf32>
    tpu.vector_store %arg7[%c0_127, %c3_128, %c0_129, %c0_130], %171 {strides = array<i32>} : memref<1x4x2x128xf32, #tpu.memory_space<vmem>>, vector<1x1x2x128xf32>,
    return
  }
  func.func @transform_0(%arg0: i32, %arg1: i32) -> (i32, i32, i32, i32) {
    %c0_i32 = arith.constant 0 : i32
    %c0_i32_0 = arith.constant 0 : i32
    %c0_i32_1 = arith.constant 0 : i32
    return %arg0, %c0_i32, %arg1, %c0_i32_0 : i32, i32, i32, i32
  }
  func.func @transform_1(%arg0: i32, %arg1: i32) -> (i32, i32) {
    %c0_i32 = arith.constant 0 : i32
    %c0_i32_0 = arith.constant 0 : i32
    %c0_i32_1 = arith.constant 0 : i32
    return %c0_i32, %c0_i32_0 : i32, i32
  }
  func.func @transform_2(%arg0: i32, %arg1: i32) -> i32 {
    %c0_i32 = arith.constant 0 : i32
    %c0_i32_0 = arith.constant 0 : i32
    return %c0_i32 : i32
  }
  func.func @transform_3(%arg0: i32, %arg1: i32) -> i32 {
    %c0_i32 = arith.constant 0 : i32
    %c0_i32_0 = arith.constant 0 : i32
    return %c0_i32 : i32
  }
  func.func @transform_4(%arg0: i32, %arg1: i32) -> i32 {
    %c0_i32 = arith.constant 0 : i32
    %c0_i32_0 = arith.constant 0 : i32
    return %c0_i32 : i32
  }
  func.func @transform_5(%arg0: i32, %arg1: i32) -> (i32, i32, i32, i32) {
    %c0_i32 = arith.constant 0 : i32
    %c0_i32_0 = arith.constant 0 : i32
    %c0_i32_1 = arith.constant 0 : i32
    return %arg0, %c0_i32, %arg1, %c0_i32_0 : i32, i32, i32, i32
  }
}

</mosaic_0001>

<bundles_post_ra>
// kernel: pointwise_conv_forward.2
= control target key start
LH: loop header
LB: loop body
LE: loop exit
PB: predicated region body
PF: predicated region fallthrough
CT: control target
= control target key end

     0   :  { %10 = vsyncpa [#allocation3], 0  ;;  %s939_s0 = inlined_call_operand.vmem [shape: f32[2,4,2,128], index: 0, kind: input, shape index: {}]   ;;  %s940_s1 = inlined_call_operand.vmem [shape: f32[4,4], index: 1, kind: input, shape index: {}]   ;;  %s941_s2 = inlined_call_operand.vmem [shape: f32[4], index: 2, kind: input, shape index: {}]   ;;  %s942_s3 = inlined_call_operand.vmem [shape: f32[2,1,4,128], index: 3, kind: output, shape index: {0}]   ;;  %s943_s4 = inlined_call_operand.vmem [shape: f32[2,1,4,128], index: 4, kind: output, shape index: {1}]  }
   0x1   :  { %11 = vsyncpa [#allocation5], 0  ;;  %s782_s15 = smov 0   ;;  %s784_s16 = smov 0  }
   0x2   :  { %s786_s17 = smov 0  }
   0x3 LB: > { %s594_s18 = sadd.s32 4294967295, %s753_s17   ;;  %s29_s19 = sadd.s32 1, %s749_s16  ;;  %s753_s17 = sphi %s786_s17, %s17_s17   ;;  %s749_s16 = sphi %s784_s16, %s953_s16   ;;  %s745_s15 = sphi %s782_s15, %s952_s15  }
   0x4   : > { %p31_p0 = scmp.ge.s32.totalorder %s29_s19, 2  ;;  %p596_p1 = scmp.ge.s32.totalorder %s753_s17, 1 }
   0x5   : > { %p160_p2 = scmp.lt.s32.totalorder %s753_s17, 3  ;;  %p807_p4 = scmp.eq.s32.totalorder %s594_s18, 0 }
   0x6   : > { %s955_s19 = smov (%p31_p0, %s29_s19), 0  ;;  %s173_s24 = sshll.u32 %s940_s1, 4  ;;  %s174_s24 = int_to_ptr.vmem [resolvable:$true] %s173_s24 }
   0x7   : > { %p803_p3 = pnand %p596_p1, %p160_p2  ;;  %s184_s27 = sshll.u32 %s941_s2, 4  ;;  %s185_s27 = int_to_ptr.vmem [resolvable:$true] %s184_s27 }
   0x8   : > { %s948_s21 = scalar_select %p807_p4, 1, 0 }
   0x9   : > { %s947_s20 = scalar_select %p803_p3, 1, 0 }
   0xa   : > { %p648_p5 = pneg %p803_p3  ;;  %s693_s29 = scalar_lea.vmem %s174_s24, 64 }
   0xb   : > { %p694_p7 = scmp.ne.s32.totalorder %s174_s24, %s693_s29  ;;  %p701_p11 = scmp.lt.s32.totalorder %s174_s24, %s174_s24 }
   0xc   : > { %p821_p6 = pnand %p807_p4, %p648_p5  ;;  %p702_p12 = scmp.lt.s32.totalorder %s693_s29, %s693_s29 }
   0xe   : > { %p695_p8 = pneg %p821_p6  ;;  %p703_p13 = por %p702_p12, %p701_p11 }
  0x10   : > { %p696_p9 = pnand %p695_p8, %p694_p7 }
  0x12   : > { %p697_p10 = pneg %p696_p9 }
  0x14   : > { %p704_p0 = pnand %p703_p13, %p697_p10 }
  0x16   : > { %707 = shalt.err (!%p704_p0)
}
  0x17   : > { %s755_s30 = smov [#allocation2]   ;;  %s708_s5 = scalar_lea.vmem %s185_s27, 16 }
  0x18   : > { %651 = dma.vmem_to_smem (!%p821_p6), %s174_s24, 64, %s755_s30, [#allocation3]  }
  0x19   : > { %p709_p1 = scmp.ne.s32.totalorder %s185_s27, %s708_s5  ;;  %p716_p4 = scmp.lt.s32.totalorder %s185_s27, %s185_s27 }
  0x1a   : > { %p717_p3 = scmp.lt.s32.totalorder %s708_s5, %s708_s5 }
  0x1b   : > { %p711_p2 = pnand %p709_p1, %p695_p8 }
  0x1c   : > { %p718_p7 = por %p717_p3, %p716_p4 }
  0x1d   : > { %p712_p5 = pneg %p711_p2 }
  0x1f   : > { %p719_p9 = pnand %p718_p7, %p712_p5 }
  0x21   : > { %722 = shalt.err (!%p719_p9)
}
  0x22   : > { %s756_s6 = smov [#allocation4]   ;;  %p950_p10 = scmp.ne.s32.totalorder %s947_s20, 0 }
  0x23   : > { %654 = dma.vmem_to_smem (!%p821_p6), %s185_s27, 16, %s756_s6, [#allocation5]  }
  0x24   : > { %208 = sbr.rel (%p950_p10) target bundleno = 111 (0x6f), region = 32  ;;  %p951_p11 = scmp.ne.s32.totalorder (!%p950_p10), %s948_s21, 0 }
  0x2b   : > { %736 = dma.done.wait (%p951_p11), [#allocation3], 64  }
  0x2c   : > { %738 = vsyncadd (%p951_p11), [#allocation3], 4294967232 }
  0x2d   : > { %740 = dma.done.wait (%p951_p11), [#allocation5], 16  }
  0x2e   : > { %742 = vsyncadd (%p951_p11), [#allocation5], 4294967280 }
  0x2f   : > { %218 = sfence }
  0x30   : > { %p251_p3 = scmp.lt.s32.totalorder %s745_s15, 1  ;;  %s274_s7 = sld [smem:[#allocation2]]  ;;  %vm303_vm0 = vcmask 1041408  }
  0x31   : > { %s608_s8 = sld [smem:[#allocation2 + $0x1]]  ;;  %s610_s9 = sld [smem:[#allocation2 + $0x2]] }
  0x32   : > { %s957_s15 = smov (!%p251_p3, %s745_s15), 1  ;;  %s612_s10 = sld [smem:[#allocation2 + $0x3]] }
  0x33   : > { %s639_s11 = sshll.u32 %s957_s15, 3  ;;  %s851_s18 = sld [smem:[#allocation4]] }
  0x34   : > { %s849_s14 = scalar_lea.vmem %s939_s0, %s639_s11  ;;  %s613_s20 = sld [smem:[#allocation2 + $0x80]] }
  0x35   : > { %v273_v0 = vld [vmem:[%s849_s14] sm:$0x3]  ;;  %v607_v2 = vld [vmem:[%s849_s14 + $0x2] sm:$0x3]  ;;  %v609_v3 = vld [vmem:[%s849_s14 + $0x4] sm:$0x3] }
  0x36   : > { %v275_v1 = vstv %s274_s7  ;;  %v611_v7 = vld [vmem:[%s849_s14 + $0x6] sm:$0x3]  ;;  %s615_s21 = sld [smem:[#allocation2 + $0x81]]  ;;  %s617_s22 = sld [smem:[#allocation2 + $0x82]]  ;;  %v321_v13 = vld [vmem:[%s849_s14] sm:$0x3] }
  0x37   : > { %v276_v4 = vmul.f32 %v275_v1, %v273_v0  ;;  %v280_v5 = vstv %s608_s8  ;;  %v286_v6 = vstv %s610_s9  ;;  %s857_s23 = sld [smem:[#allocation2 + $0x83]]  ;;  %s859_s24 = sld [smem:[#allocation2 + $0x100]]  ;;  %v614_v15 = vld [vmem:[%s849_s14 + $0x2] sm:$0x3]  ;;  %v616_v18 = vld [vmem:[%s849_s14 + $0x4] sm:$0x3] }
  0x38   : > { %v281_v8 = vmul.f32 %v607_v2, %v280_v5  ;;  %v287_v9 = vmul.f32 %v609_v3, %v286_v6  ;;  %v292_v10 = vstv %s612_s10  ;;  %s862_s25 = sld [smem:[#allocation4 + $0x1]]  ;;  %s867_s27 = sld [smem:[#allocation2 + $0x102]]  ;;  %v618_v19 = vld [vmem:[%s849_s14 + $0x6] sm:$0x3]  ;;  %v365_v23 = vld [vmem:[%s849_s14] sm:$0x3] }
  0x39   : > { %v293_v12 = vmul.f32 %v611_v7, %v292_v10  ;;  %s864_s26 = sld [smem:[#allocation2 + $0x101]]  ;;  %s869_s28 = sld [smem:[#allocation2 + $0x103]]  ;;  %v296_v16 = vstv %s851_s18  ;;  %v622_v27 = vld [vmem:[%s849_s14 + $0x2] sm:$0x3]  ;;  %v624_v34 = vld [vmem:[%s849_s14 + $0x4] sm:$0x3] }
  0x3a   : > { %v282_v11 = vadd.f32 %v281_v8, %v276_v4  ;;  %v323_v17 = vstv %s613_s20  ;;  %s874_s29 = sld [smem:[#allocation2 + $0x180]]  ;;  %s877_s30 = sld [smem:[#allocation4 + $0x2]]  ;;  %v626_v35 = vld [vmem:[%s849_s14 + $0x6] sm:$0x3]  ;;  %v409_v39 = vld [vmem:[%s849_s14] sm:$0x3] }
  0x3b   : > { %v324_v21 = vmul.f32 %v323_v17, %v321_v13  ;;  %s879_s5 = sld [smem:[#allocation2 + $0x181]]  ;;  %s883_s6 = sld [smem:[#allocation2 + $0x182]]  ;;  %v630_v40 = vld [vmem:[%s849_s14 + $0x2] sm:$0x3]  ;;  %v632_v45 = vld [vmem:[%s849_s14 + $0x4] sm:$0x3] }
  0x3c   : > { %v288_v14 = vadd.f32 %v287_v9, %v282_v11  ;;  %v327_v22 = vstv %s615_s21  ;;  %v332_v25 = vstv %s617_s22  ;;  %s885_s7 = sld [smem:[#allocation2 + $0x183]]  ;;  %v634_v53 = vld [vmem:[%s849_s14 + $0x6] sm:$0x3]  ;;  %s605_s9 = sshll.u32 %s957_s15, 2 }
  0x3d   : > { %v328_v24 = vmul.f32 %v614_v15, %v327_v22  ;;  %v337_v26 = vstv %s857_s23  ;;  %v333_v29 = vmul.f32 %v616_v18, %v332_v25  ;;  %v367_v32 = vstv %s859_s24  ;;  %s636_s8 = sld [smem:[#allocation4 + $0x3]]  ;;  %s911_s12 = scalar_lea.vmem %s942_s3, %s605_s9 }
  0x3e   : > { %v294_v20 = vadd.f32 %v293_v12, %v288_v14  ;;  %v338_v31 = vmul.f32 %v618_v19, %v337_v26  ;;  %v368_v37 = vmul.f32 %v367_v32, %v365_v23  ;;  %v341_v42 = vstv %s862_s25  ;;  %s917_s14 = scalar_lea.vmem %s943_s4, %s605_s9 }
  0x3f   : > { %v329_v30 = vadd.f32 %v328_v24, %v324_v21  ;;  %v371_v33 = vstv %s864_s26  ;;  %v376_v43 = vstv %s867_s27  ;;  %v381_v44 = vstv %s869_s28 }
  0x40   : > { %v297_v28 = vadd.f32 %v296_v16, %v294_v20  ;;  %v372_v38 = vmul.f32 %v622_v27, %v371_v33  ;;  %v377_v47 = vmul.f32 %v624_v34, %v376_v43  ;;  %v382_v48 = vmul.f32 %v626_v35, %v381_v44 }
  0x41   : > { %v334_v41 = vadd.f32 %v333_v29, %v329_v30  ;;  %v411_v50 = vstv %s874_s29  ;;  %v415_v51 = vstv %s879_s5  ;;  %v420_v52 = vstv %s883_s6 }
  0x42   : > { %v299_v36 = vmul.f32 0.70710677, %v297_v28  ;;  %v373_v46 = vadd.f32 %v372_v38, %v368_v37  ;;  %v412_v55 = vmul.f32 %v411_v50, %v409_v39  ;;  %v416_v56 = vmul.f32 %v630_v40, %v415_v51 }
  0x43   : > { %v339_v49 = vadd.f32 %v338_v31, %v334_v41  ;;  %v421_v57 = vmul.f32 %v632_v45, %v420_v52  ;;  %v385_v59 = vstv %s877_s30  ;;  %v425_v60 = vstv %s885_s7 }
  0x44   : > { %685 = verf.f32 %v299_v36  ;;  %v378_v54 = vadd.f32 %v377_v47, %v373_v46  ;;  %v417_v62 = vadd.f32 %v416_v56, %v412_v55  ;;  %v426_v63 = vmul.f32 %v634_v53, %v425_v60 }
  0x45   : > { %v342_v58 = vadd.f32 %v341_v42, %v339_v49  ;;  %v429_v3 = vstv %s636_s8  ;;  %v298_v6 = vmul.f32 0.5, %v297_v28 }
  0x46   : > { %v383_v61 = vadd.f32 %v382_v48, %v378_v54  ;;  %v422_v2 = vadd.f32 %v421_v57, %v417_v62 }
  0x47   : > { %v344_v0 = vmul.f32 0.70710677, %v342_v58  ;;  %v343_v15 = vmul.f32 0.5, %v342_v58 }
  0x48   : > { %v386_v1 = vadd.f32 %v385_v59, %v383_v61  ;;  %v427_v5 = vadd.f32 %v426_v63, %v422_v2 }
  0x49   : > { %687 = verf.f32 %v344_v0 }
  0x4a   : > { %v388_v4 = vmul.f32 0.70710677, %v386_v1  ;;  %v430_v8 = vadd.f32 %v429_v3, %v427_v5  ;;  %v387_v21 = vmul.f32 0.5, %v386_v1 }
  0x4c   : > { %689 = verf.f32 %v388_v4  ;;  %v432_v10 = vmul.f32 0.70710677, %v430_v8  ;;  %v431_v37 = vmul.f32 0.5, %v430_v8 }
  0x4e   : > { %v686_v7 = vpop.eup %685  ;;  %691 = verf.f32 %v432_v10 }
  0x4f   : > { %v301_v9 = vadd.f32 1.0, %v686_v7 }
  0x51   : > { %v302_v11 = vmul.f32 %v301_v9, %v298_v6 }
  0x53   : > { %v304_v12 = vsel %vm303_vm0, %v302_v11, 0.0  ;;  %v312_v13 = vmul.f32 %v302_v11, %v302_v11  ;;  %v688_v16 = vpop.eup %687 }
  0x54   : > { %v305_v14 = vrot.slane %v304_v12, 4  ;;  %v346_v20 = vadd.f32 1.0, %v688_v16 }
  0x55   : > { %v313_v17 = vsel %vm303_vm0, %v312_v13, 0.0 }
  0x56   : > { %v306_v18 = vadd.f32 %v305_v14, %v304_v12  ;;  %v314_v19 = vrot.slane %v313_v17, 4  ;;  %v690_v22 = vpop.eup %689  ;;  %v347_v25 = vmul.f32 %v346_v20, %v343_v15 }
  0x57   : > { %v390_v26 = vadd.f32 1.0, %v690_v22 }
  0x58   : > { %v307_v23 = vrot.slane %v306_v18, 2  ;;  %v315_v24 = vadd.f32 %v314_v19, %v313_v17  ;;  %v348_v29 = vsel %vm303_vm0, %v347_v25, 0.0  ;;  %v356_v30 = vmul.f32 %v347_v25, %v347_v25  ;;  %v692_v33 = vpop.eup %691 }
  0x59   : > { %v349_v31 = vrot.slane %v348_v29, 4  ;;  %v391_v32 = vmul.f32 %v390_v26, %v387_v21  ;;  %v434_v45 = vadd.f32 1.0, %v692_v33 }
  0x5a   : > { %v308_v27 = vadd.f32 %v307_v23, %v306_v18  ;;  %v316_v28 = vrot.slane %v315_v24, 2  ;;  %v357_v36 = vsel %vm303_vm0, %v356_v30, 0.0 }
  0x5b   : > { %v350_v38 = vadd.f32 %v349_v31, %v348_v29  ;;  %v358_v39 = vrot.slane %v357_v36, 4  ;;  %v392_v40 = vsel %vm303_vm0, %v391_v32, 0.0  ;;  %v400_v41 = vmul.f32 %v391_v32, %v391_v32 }
  0x5c   : > { %v309_v34 = vrot.slane %v308_v27, 1  ;;  %v317_v35 = vadd.f32 %v316_v28, %v315_v24  ;;  %v393_v44 = vrot.slane %v392_v40, 4  ;;  %v435_v52 = vmul.f32 %v434_v45, %v431_v37 }
  0x5d   : > { %v351_v46 = vrot.slane %v350_v38, 2  ;;  %v359_v47 = vadd.f32 %v358_v39, %v357_v36  ;;  %v401_v48 = vsel %vm303_vm0, %v400_v41, 0.0 }
  0x5e   : > { %v310_v42 = vadd.f32 %v309_v34, %v308_v27  ;;  %v318_v43 = vrot.slane %v317_v35, 1  ;;  %v394_v50 = vadd.f32 %v393_v44, %v392_v40  ;;  %v402_v51 = vrot.slane %v401_v48, 4 }
  0x5f   : > { %v352_v53 = vadd.f32 %v351_v46, %v350_v38  ;;  %v360_v54 = vrot.slane %v359_v47, 2  ;;  %v436_v57 = vsel %vm303_vm0, %v435_v52, 0.0  ;;  %v444_v58 = vmul.f32 %v435_v52, %v435_v52 }
  0x60   : > { %311 = vst [vmem:[%s911_s12] sm:$0x1] %v310_v42  ;;  %v319_v49 = vadd.f32 %v318_v43, %v317_v35  ;;  %v395_v55 = vrot.slane %v394_v50, 2  ;;  %v403_v56 = vadd.f32 %v402_v51, %v401_v48  ;;  %v437_v61 = vrot.slane %v436_v57, 4 }
  0x61   : > { %v353_v59 = vrot.slane %v352_v53, 1  ;;  %v361_v60 = vadd.f32 %v360_v54, %v359_v47  ;;  %v445_v0 = vsel %vm303_vm0, %v444_v58, 0.0 }
  0x62   : > { %320 = vst [vmem:[%s917_s14] sm:$0x1] %v319_v49  ;;  %v396_v62 = vadd.f32 %v395_v55, %v394_v50  ;;  %v404_v63 = vrot.slane %v403_v56, 2  ;;  %v438_v3 = vadd.f32 %v437_v61, %v436_v57  ;;  %v446_v4 = vrot.slane %v445_v0, 4 }
  0x63   : > { %v354_v1 = vadd.f32 %v353_v59, %v352_v53  ;;  %v362_v2 = vrot.slane %v361_v60, 1 }
  0x64   : > { %v397_v5 = vrot.slane %v396_v62, 1  ;;  %v405_v6 = vadd.f32 %v404_v63, %v403_v56  ;;  %v439_v8 = vrot.slane %v438_v3, 2  ;;  %v447_v9 = vadd.f32 %v446_v4, %v445_v0 }
  0x65   : > { %355 = vst [vmem:[%s911_s12 + $0x1] sm:$0x1] %v354_v1  ;;  %v363_v7 = vadd.f32 %v362_v2, %v361_v60 }
  0x66   : > { %v398_v10 = vadd.f32 %v397_v5, %v396_v62  ;;  %v406_v11 = vrot.slane %v405_v6, 1  ;;  %v440_v12 = vadd.f32 %v439_v8, %v438_v3  ;;  %v448_v13 = vrot.slane %v447_v9, 2 }
  0x67   : > { %364 = vst [vmem:[%s917_s14 + $0x1] sm:$0x1] %v363_v7 }
  0x68   : > { %399 = vst [vmem:[%s911_s12 + $0x2] sm:$0x1] %v398_v10  ;;  %v407_v14 = vadd.f32 %v406_v11, %v405_v6  ;;  %v441_v15 = vrot.slane %v440_v12, 1  ;;  %v449_v16 = vadd.f32 %v448_v13, %v447_v9 }
  0x6a   : > { %408 = vst [vmem:[%s917_s14 + $0x2] sm:$0x1] %v407_v14  ;;  %v442_v17 = vadd.f32 %v441_v15, %v440_v12  ;;  %v450_v18 = vrot.slane %v449_v16, 1 }
  0x6c   : > { %443 = vst [vmem:[%s911_s12 + $0x3] sm:$0x1] %v442_v17  ;;  %v451_v19 = vadd.f32 %v450_v18, %v449_v16 }
  0x6e   : > { %452 = vst [vmem:[%s917_s14 + $0x3] sm:$0x1] %v451_v19 }
  0x6f PF: > { %s17_s17 = sadd.s32 1, %s753_s17   ;;  %s952_s15 = smov %s749_s16 }
  0x70   : > { %p14_p4 = scmp.ge.s32.totalorder %s17_s17, 4   ;;  %s953_s16 = smov %s955_s19 }
  0x72   :  { %16 = sbr.rel (!%p14_p4) target bundleno = 3 (0x3), region = 86 }
  0x79   :  { %498 = vsyncpa [#allocation3], 1 }
  0x7a   :  { %500 = vsyncpa [#allocation3 + $0x1], 1 }
  0x7b   :  { %501 = vsyncpa [#allocation5], 1 }

// kernel: pointwise_conv_forward.3
= control target key start
LH: loop header
LB: loop body
LE: loop exit
PB: predicated region body
PF: predicated region fallthrough
CT: control target
= control target key end

     0   :  { %10 = vsyncpa [#allocation3], 0  ;;  %s1013_s0 = inlined_call_operand.vmem [shape: f32[2,4,2,128], index: 0, kind: input, shape index: {}]   ;;  %s1014_s1 = inlined_call_operand.vmem [shape: f32[4,4], index: 1, kind: input, shape index: {}]   ;;  %s1015_s2 = inlined_call_operand.vmem [shape: f32[4], index: 2, kind: input, shape index: {}]   ;;  %s1016_s3 = inlined_call_operand.vmem [shape: f32[4], index: 3, kind: input, shape index: {}]   ;;  %s1017_s4 = inlined_call_operand.vmem [shape: f32[4], index: 4, kind: input, shape index: {}]   ;;  %s1018_s5 = inlined_call_operand.vmem [shape: f32[2,4,2,128], index: 5, kind: output, shape index: {}]  }
   0x1   :  { %11 = vsyncpa [#allocation5], 0 }
   0x2   :  { %12 = vsyncpa [#allocation8], 0  ;;  %s838_s18 = smov 0   ;;  %s840_s19 = smov 0  }
   0x3   :  { %s842_s20 = smov 0  }
   0x4 LB: > { %s199_s23 = sshll.u32 %s1015_s2, 4  ;;  %s575_s24 = sadd.s32 4294967295, %s802_s20   ;;  %s802_s20 = sphi %s842_s20, %s18_s20   ;;  %s798_s19 = sphi %s840_s19, %s1029_s19   ;;  %s794_s18 = sphi %s838_s18, %s1028_s18   ;;  %s200_s23 = int_to_ptr.vmem [resolvable:$true] %s199_s23 }
   0x5   : > { %p577_p0 = scmp.ge.s32.totalorder %s802_s20, 1  ;;  %p175_p1 = scmp.lt.s32.totalorder %s802_s20, 3 }
   0x6   : > { %p859_p2 = scmp.eq.s32.totalorder %s575_s24, 0  ;;  %s30_s27 = sadd.s32 1, %s798_s19 }
   0x7   : > { %p863_p3 = pnand %p577_p0, %p175_p1  ;;  %s188_s30 = sshll.u32 %s1014_s1, 4  ;;  %s189_s30 = int_to_ptr.vmem [resolvable:$true] %s188_s30 }
   0x8   : > { %s1022_s25 = scalar_select %p859_p2, 1, 0 }
   0x9   : > { %s1023_s26 = scalar_select %p863_p3, 1, 0 }
   0xa   : > { %p651_p4 = pneg %p863_p3  ;;  %p879_p6 = scmp.ge.s32.totalorder %s30_s27, 2 }
   0xb   : > { %s210_s10 = sshll.u32 %s1016_s3, 4  ;;  %s708_s11 = scalar_lea.vmem %s200_s23, 16  ;;  %s211_s10 = int_to_ptr.vmem [resolvable:$true] %s210_s10 }
   0xc   : > { %p875_p5 = pnand %p859_p2, %p651_p4  ;;  %p709_p7 = scmp.ne.s32.totalorder %s200_s23, %s708_s11 }
   0xd   : > { %p716_p11 = scmp.lt.s32.totalorder %s200_s23, %s200_s23  ;;  %p717_p12 = scmp.lt.s32.totalorder %s708_s11, %s708_s11 }
   0xe   : > { %p710_p8 = pneg %p875_p5 }
   0xf   : > { %p718_p13 = por %p717_p12, %p716_p11 }
  0x10   : > { %p711_p9 = pnand %p710_p8, %p709_p7 }
  0x12   : > { %p712_p10 = pneg %p711_p9 }
  0x14   : > { %p719_p0 = pnand %p718_p13, %p712_p10 }
  0x16   : > { %722 = shalt.err (!%p719_p0)
}
  0x17   : > { %s804_s12 = smov [#allocation4]   ;;  %s1031_s27 = smov (%p879_p6, %s30_s27), 0 }
  0x18   : > { %657 = dma.vmem_to_smem (!%p875_p5), %s200_s23, 16, %s804_s12, [#allocation5]  }
  0x19   : > { %s723_s13 = scalar_lea.vmem %s189_s30, 64  ;;  %p731_p9 = scmp.lt.s32.totalorder %s189_s30, %s189_s30 }
  0x1a   : > { %p724_p1 = scmp.ne.s32.totalorder %s189_s30, %s723_s13  ;;  %p732_p2 = scmp.lt.s32.totalorder %s723_s13, %s723_s13 }
  0x1c   : > { %p726_p4 = pnand %p724_p1, %p710_p8  ;;  %p733_p11 = por %p732_p2, %p731_p9 }
  0x1e   : > { %p727_p7 = pneg %p726_p4 }
  0x20   : > { %p734_p10 = pnand %p733_p11, %p727_p7 }
  0x22   : > { %737 = shalt.err (!%p734_p10)
}
  0x23   : > { %s805_s14 = smov [#allocation2]   ;;  %s738_s15 = scalar_lea.vmem %s211_s10, 16 }
  0x24   : > { %654 = dma.vmem_to_smem (!%p875_p5), %s189_s30, 64, %s805_s14, [#allocation3]  }
  0x25   : > { %p739_p6 = scmp.ne.s32.totalorder %s211_s10, %s738_s15  ;;  %p746_p0 = scmp.lt.s32.totalorder %s211_s10, %s211_s10 }
  0x26   : > { %p747_p1 = scmp.lt.s32.totalorder %s738_s15, %s738_s15 }
  0x27   : > { %p741_p12 = pnand %p739_p6, %p710_p8 }
  0x28   : > { %p748_p4 = por %p747_p1, %p746_p0 }
  0x29   : > { %p742_p13 = pneg %p741_p12 }
  0x2b   : > { %p749_p3 = pnand %p748_p4, %p742_p13 }
  0x2d   : > { %752 = shalt.err (!%p749_p3)
}
  0x2e   : > { %s806_s16 = smov [#allocation6]   ;;  %s221_s22 = sshll.u32 %s1017_s4, 4  ;;  %s222_s22 = int_to_ptr.vmem [resolvable:$true] %s221_s22 }
  0x2f   : > { %660 = dma.vmem_to_smem (!%p875_p5), %s211_s10, 16, %s806_s16, [#allocation5]  }
  0x30   : > { %s753_s23 = scalar_lea.vmem %s222_s22, 16  ;;  %p761_p11 = scmp.lt.s32.totalorder %s222_s22, %s222_s22 }
  0x31   : > { %p754_p2 = scmp.ne.s32.totalorder %s222_s22, %s753_s23  ;;  %p762_p10 = scmp.lt.s32.totalorder %s753_s23, %s753_s23 }
  0x33   : > { %p756_p7 = pnand %p754_p2, %p710_p8  ;;  %p763_p6 = por %p762_p10, %p761_p11 }
  0x35   : > { %p757_p9 = pneg %p756_p7 }
  0x37   : > { %p764_p3 = pnand %p763_p6, %p757_p9 }
  0x39   : > { %767 = shalt.err (!%p764_p3)
}
  0x3a   : > { %s807_s24 = smov [#allocation7]   ;;  %p1026_p12 = scmp.ne.s32.totalorder %s1023_s26, 0 }
  0x3b   : > { %663 = dma.vmem_to_smem (!%p875_p5), %s222_s22, 16, %s807_s24, [#allocation8]  }
  0x3c   : > { %245 = sbr.rel (%p1026_p12) target bundleno = 124 (0x7c), region = 40  ;;  %p1027_p13 = scmp.ne.s32.totalorder (!%p1026_p12), %s1022_s25, 0 }
  0x43   : > { %781 = dma.done.wait (%p1027_p13), [#allocation3], 64  }
  0x44   : > { %783 = vsyncadd (%p1027_p13), [#allocation3], 4294967232 }
  0x45   : > { %785 = dma.done.wait (%p1027_p13), [#allocation5], 32  }
  0x46   : > { %787 = vsyncadd (%p1027_p13), [#allocation5], 4294967264 }
  0x47   : > { %789 = dma.done.wait (%p1027_p13), [#allocation8], 16  }
  0x48   : > { %791 = vsyncadd (%p1027_p13), [#allocation8], 4294967280 }
  0x49   : > { %263 = sfence }
  0x4a   : > { %p292_p5 = scmp.lt.s32.totalorder %s794_s18, 1  ;;  %s309_s26 = sld [smem:[#allocation2]] }
  0x4b   : > { %s593_s28 = sld [smem:[#allocation2 + $0x1]]  ;;  %s595_s29 = sld [smem:[#allocation2 + $0x2]] }
  0x4c   : > { %s1033_s18 = smov (!%p292_p5, %s794_s18), 1  ;;  %s597_s30 = sld [smem:[#allocation2 + $0x3]] }
  0x4d   : > { %s633_s6 = sshll.u32 %s1033_s18, 3  ;;  %s941_s25 = sld [smem:[#allocation4]] }
  0x4e   : > { %s939_s9 = scalar_lea.vmem %s1013_s0, %s633_s6  ;;  %s598_s10 = sld [smem:[#allocation2 + $0x80]] }
  0x4f   : > { %v308_v0 = vld [vmem:[%s939_s9] sm:$0x3]  ;;  %v592_v2 = vld [vmem:[%s939_s9 + $0x2] sm:$0x3]  ;;  %v594_v3 = vld [vmem:[%s939_s9 + $0x4] sm:$0x3] }
  0x50   : > { %v310_v1 = vstv %s309_s26  ;;  %v596_v7 = vld [vmem:[%s939_s9 + $0x6] sm:$0x3]  ;;  %s600_s11 = sld [smem:[#allocation2 + $0x81]]  ;;  %s602_s12 = sld [smem:[#allocation2 + $0x82]]  ;;  %v345_v13 = vld [vmem:[%s939_s9] sm:$0x3] }
  0x51   : > { %v311_v4 = vmul.f32 %v310_v1, %v308_v0  ;;  %v315_v5 = vstv %s593_s28  ;;  %v321_v6 = vstv %s595_s29  ;;  %s604_s13 = sld [smem:[#allocation2 + $0x83]]  ;;  %s948_s14 = sld [smem:[#allocation4 + $0x1]]  ;;  %v599_v15 = vld [vmem:[%s939_s9 + $0x2] sm:$0x3]  ;;  %v601_v17 = vld [vmem:[%s939_s9 + $0x4] sm:$0x3] }
  0x52   : > { %v316_v8 = vmul.f32 %v592_v2, %v315_v5  ;;  %v322_v9 = vmul.f32 %v594_v3, %v321_v6  ;;  %v327_v10 = vstv %s597_s30  ;;  %s951_s15 = sld [smem:[#allocation2 + $0x100]]  ;;  %s953_s16 = sld [smem:[#allocation2 + $0x101]]  ;;  %v603_v21 = vld [vmem:[%s939_s9 + $0x6] sm:$0x3]  ;;  %v380_v25 = vld [vmem:[%s939_s9] sm:$0x3] }
  0x53   : > { %v328_v12 = vmul.f32 %v596_v7, %v327_v10  ;;  %v331_v16 = vstv %s941_s25  ;;  %s957_s17 = sld [smem:[#allocation2 + $0x102]]  ;;  %s959_s21 = sld [smem:[#allocation2 + $0x103]]  ;;  %v610_v29 = vld [vmem:[%s939_s9 + $0x2] sm:$0x3]  ;;  %v612_v32 = vld [vmem:[%s939_s9 + $0x4] sm:$0x3] }
  0x54   : > { %v317_v11 = vadd.f32 %v316_v8, %v311_v4  ;;  %v347_v19 = vstv %s598_s10  ;;  %s963_s22 = sld [smem:[#allocation4 + $0x2]]  ;;  %s965_s23 = sld [smem:[#allocation2 + $0x180]]  ;;  %v614_v36 = vld [vmem:[%s939_s9 + $0x6] sm:$0x3]  ;;  %v415_v44 = vld [vmem:[%s939_s9] sm:$0x3] }
  0x55   : > { %v348_v22 = vmul.f32 %v347_v19, %v345_v13  ;;  %s968_s24 = sld [smem:[#allocation2 + $0x181]]  ;;  %s970_s26 = sld [smem:[#allocation2 + $0x182]]  ;;  %v621_v45 = vld [vmem:[%s939_s9 + $0x2] sm:$0x3]  ;;  %v623_v49 = vld [vmem:[%s939_s9 + $0x4] sm:$0x3] }
  0x56   : > { %v323_v14 = vadd.f32 %v322_v9, %v317_v11  ;;  %v351_v20 = vstv %s600_s11  ;;  %v356_v24 = vstv %s602_s12  ;;  %s973_s28 = sld [smem:[#allocation2 + $0x183]]  ;;  %v625_v57 = vld [vmem:[%s939_s9 + $0x6] sm:$0x3]  ;;  %s338_s30 = sld [smem:[#allocation6]] }
  0x57   : > { %v352_v23 = vmul.f32 %v599_v15, %v351_v20  ;;  %v357_v27 = vmul.f32 %v601_v17, %v356_v24  ;;  %v361_v28 = vstv %s604_s13  ;;  %v365_v41 = vstv %s948_s14  ;;  %s983_s29 = sld [smem:[#allocation4 + $0x3]]  ;;  %s341_s7 = sld [smem:[#allocation7]] }
  0x58   : > { %v329_v18 = vadd.f32 %v328_v12, %v323_v14  ;;  %v362_v31 = vmul.f32 %v603_v21, %v361_v28  ;;  %v382_v34 = vstv %s951_s15  ;;  %v386_v35 = vstv %s953_s16  ;;  %s606_s8 = sld [smem:[#allocation6 + $0x1]]  ;;  %s617_s25 = sld [smem:[#allocation6 + $0x2]] }
  0x59   : > { %v353_v30 = vadd.f32 %v352_v23, %v348_v22  ;;  %v383_v38 = vmul.f32 %v382_v34, %v380_v25  ;;  %v387_v39 = vmul.f32 %v610_v29, %v386_v35  ;;  %v391_v40 = vstv %s957_s17  ;;  %s607_s9 = sld [smem:[#allocation7 + $0x1]]  ;;  %s998_s12 = scalar_lea.vmem %s1018_s5, %s633_s6 }
  0x5a   : > { %v332_v26 = vadd.f32 %v331_v16, %v329_v18  ;;  %v392_v42 = vmul.f32 %v612_v32, %v391_v40  ;;  %v396_v43 = vstv %s959_s21  ;;  %v417_v50 = vstv %s965_s23  ;;  %s618_s13 = sld [smem:[#allocation7 + $0x2]]  ;;  %s628_s14 = sld [smem:[#allocation6 + $0x3]] }
  0x5b   : > { %v358_v37 = vadd.f32 %v357_v27, %v353_v30  ;;  %v388_v47 = vadd.f32 %v387_v39, %v383_v38  ;;  %v397_v48 = vmul.f32 %v614_v36, %v396_v43  ;;  %v421_v51 = vstv %s968_s24  ;;  %s629_s18 = sld [smem:[#allocation7 + $0x3]] }
  0x5c   : > { %v334_v33 = vmul.f32 0.70710677, %v332_v26  ;;  %v426_v52 = vstv %s970_s26  ;;  %v418_v55 = vmul.f32 %v417_v50, %v415_v44  ;;  %v422_v56 = vmul.f32 %v621_v45, %v421_v51 }
  0x5d   : > { %v363_v46 = vadd.f32 %v362_v31, %v358_v37  ;;  %v393_v54 = vadd.f32 %v392_v42, %v388_v47  ;;  %v400_v58 = vstv %s963_s22  ;;  %v427_v59 = vmul.f32 %v623_v49, %v426_v52 }
  0x5e   : > { %700 = verf.f32 %v334_v33  ;;  %v431_v60 = vstv %s973_s28  ;;  %v423_v63 = vadd.f32 %v422_v56, %v418_v55  ;;  %v435_v3 = vstv %s983_s29 }
  0x5f   : > { %v366_v53 = vadd.f32 %v365_v41, %v363_v46  ;;  %v398_v62 = vadd.f32 %v397_v48, %v393_v54  ;;  %v432_v0 = vmul.f32 %v625_v57, %v431_v60  ;;  %v333_v4 = vmul.f32 0.5, %v332_v26 }
  0x60   : > { %v428_v2 = vadd.f32 %v427_v59, %v423_v63  ;;  %v339_v10 = vstv %s338_s30  ;;  %v342_v13 = vstv %s341_s7  ;;  %v373_v19 = vstv %s606_s8 }
  0x61   : > { %v368_v61 = vmul.f32 0.70710677, %v366_v53  ;;  %v401_v1 = vadd.f32 %v400_v58, %v398_v62  ;;  %v367_v15 = vmul.f32 0.5, %v366_v53  ;;  %v376_v23 = vstv %s607_s9 }
  0x62   : > { %v433_v6 = vadd.f32 %v432_v0, %v428_v2  ;;  %v408_v26 = vstv %s617_s25  ;;  %v411_v31 = vstv %s618_s13  ;;  %v443_v34 = vstv %s628_s14 }
  0x63   : > { %702 = verf.f32 %v368_v61  ;;  %v403_v5 = vmul.f32 0.70710677, %v401_v1  ;;  %v402_v21 = vmul.f32 0.5, %v401_v1  ;;  %v446_v37 = vstv %s629_s18 }
  0x64   : > { %v436_v9 = vadd.f32 %v435_v3, %v433_v6 }
  0x65   : > { %704 = verf.f32 %v403_v5 }
  0x66   : > { %v438_v12 = vmul.f32 0.70710677, %v436_v9  ;;  %v437_v29 = vmul.f32 0.5, %v436_v9 }
  0x68   : > { %v701_v7 = vpop.eup %700  ;;  %706 = verf.f32 %v438_v12 }
  0x69   : > { %v336_v8 = vadd.f32 1.0, %v701_v7 }
  0x6b   : > { %v337_v11 = vmul.f32 %v336_v8, %v333_v4 }
  0x6d   : > { %v340_v14 = vmul.f32 %v339_v10, %v337_v11  ;;  %v703_v16 = vpop.eup %702 }
  0x6e   : > { %v370_v18 = vadd.f32 1.0, %v703_v16 }
  0x6f   : > { %v343_v17 = vadd.f32 %v342_v13, %v340_v14  ;;  %v705_v22 = vpop.eup %704 }
  0x70   : > { %v371_v20 = vmul.f32 %v370_v18, %v367_v15  ;;  %v405_v25 = vadd.f32 1.0, %v705_v22 }
  0x71   : > { %344 = vst [vmem:[%s998_s12] sm:$0x3] %v343_v17 }
  0x72   : > { %v374_v24 = vmul.f32 %v373_v19, %v371_v20  ;;  %v406_v28 = vmul.f32 %v405_v25, %v402_v21  ;;  %v707_v30 = vpop.eup %706 }
  0x73   : > { %v440_v33 = vadd.f32 1.0, %v707_v30 }
  0x74   : > { %v377_v27 = vadd.f32 %v376_v23, %v374_v24  ;;  %v409_v32 = vmul.f32 %v408_v26, %v406_v28 }
  0x75   : > { %v441_v36 = vmul.f32 %v440_v33, %v437_v29 }
  0x76   : > { %608 = vst [vmem:[%s998_s12 + $0x2] sm:$0x3] %v377_v27  ;;  %v412_v35 = vadd.f32 %v411_v31, %v409_v32 }
  0x77   : > { %v444_v38 = vmul.f32 %v443_v34, %v441_v36 }
  0x78   : > { %619 = vst [vmem:[%s998_s12 + $0x4] sm:$0x3] %v412_v35 }
  0x79   : > { %v447_v39 = vadd.f32 %v446_v37, %v444_v38 }
  0x7b   : > { %630 = vst [vmem:[%s998_s12 + $0x6] sm:$0x3] %v447_v39 }
  0x7c PF: > { %s18_s20 = sadd.s32 1, %s802_s20   ;;  %s1028_s18 = smov %s798_s19 }
  0x7d   : > { %p15_p8 = scmp.ge.s32.totalorder %s18_s20, 4   ;;  %s1029_s19 = smov %s1031_s27 }
  0x7f   :  { %17 = sbr.rel (!%p15_p8) target bundleno = 4 (0x4), region = 93 }
  0x86   :  { %477 = vsyncpa [#allocation3], 1 }
  0x87   :  { %479 = vsyncpa [#allocation3 + $0x1], 1 }
  0x88   :  { %480 = vsyncpa [#allocation5], 1 }
  0x89   :  { %481 = vsyncpa [#allocation8], 1 }

</bundles_post_ra>
